<compile_context>
chip_gen: v7x
topology: tpu7x:2x2x1
jax: 0.10.0
libtpu: 0.0.40
codegen_flags: <defaults>
</compile_context>

<pallas_src>
import functools
import math

import jax
import jax.numpy as jnp
from jax.experimental import pallas as pl
from jax.experimental.pallas import tpu as pltpu  # noqa: F401

# ----------------------------- small deterministic config -----------------------------
EMBED_DIM = 32          # args.decoder_embed_dim
VALUE_DIM = 32          # args.decoder_value_embed_dim
NUM_HEADS = 2           # args.decoder_retention_heads
FFN_DIM = 64            # args.decoder_ffn_embed_dim
NUM_LAYERS = 2          # args.decoder_layers
N_TOKENS = [17, 23, 11]  # encoding['n_tokens'] (3 token streams)
TOTAL_TOKENS = sum(N_TOKENS)
LAYERNORM_EPS = 1e-5
BATCH = 2
SEQ = 8
ROWS = BATCH * SEQ      # batch folded into the row axis

KEY_DIM = EMBED_DIM // NUM_HEADS     # per-head key dim
HEAD_DIM = VALUE_DIM // NUM_HEADS    # per-head value dim
SCALING = KEY_DIM ** -0.5
EMBED_SCALE = math.sqrt(EMBED_DIM)   # no_scale_embedding = False
QKVG_COLS = 4 * EMBED_DIM + 2 * VALUE_DIM   # fused [q | rot(q) | k*s | rot(k*s) | v | g]
LOGITS_PAD = 128                     # pad fused logits weight to 128 lanes (dense stores)
HIDDEN_COLS = (NUM_LAYERS + 1) * EMBED_DIM
HIDDEN_PAD = 128                     # lane-dense inner-states slab
assert HIDDEN_PAD >= HIDDEN_COLS and LOGITS_PAD >= TOTAL_TOKENS


# ----------------------------------- Pallas kernel ------------------------------------
def _retnet_forward_kernel(tok_ref, emb_ref, lnemb_ref, sin_ref, cos_ref, mask_ref,
                           rn_w_ref, w_qkvg_ref, w_out_ref,
                           fn_w_ref, w_ffn1g_ref, w_ffn2_ref,
                           lnf_ref, w_log_ref,
                           logits_ref, hid_ref, *, eps):
    """Whole RetNetDecoder forward for the folded (B*T, D) activation slab."""
    D = EMBED_DIM
    V = VALUE_DIM

    def rms(v):
        return v * jax.lax.rsqrt(jnp.mean(v * v, axis=-1, keepdims=True) + eps)

    def mm(a, w_bf16):   # MXU matmul: bf16 operands, f32 accumulation
        return jnp.dot(a.astype(jnp.bfloat16), w_bf16, preferred_element_type=jnp.float32)

    # ----- multi-stream token embedding: one-hot matmul gather (sum over streams) -----
    ids = tok_ref[...]                                                   # (R, 3) int32
    col = jax.lax.broadcasted_iota(jnp.int32, (ROWS, TOTAL_TOKENS), 1)
    onehot = jnp.zeros((ROWS, TOTAL_TOKENS), jnp.float32)
    off = 0
    for s, n in enumerate(N_TOKENS):                                     # static unroll (3)
        onehot = onehot + (col == (ids[:, s:s + 1] + off)).astype(jnp.float32)
        off += n
    x = EMBED_SCALE * jnp.dot(onehot, emb_ref[...], preferred_element_type=jnp.float32)
    x = rms(x) * lnemb_ref[...]                     # layernorm_embedding (dropout = id)

    sin = sin_ref[...]
    cos = cos_ref[...]
    hidden_states = [x]

    for l in range(NUM_LAYERS):                                          # static unroll
        # ----- MultiScaleRetention sublayer (pre-norm) -----
        h = rms(x) * rn_w_ref[l]
        # fused weight columns: [ q | rot(q) | k*scaling | rot(k*scaling) | v | g ]
        qkvg = mm(h, w_qkvg_ref[l])                                      # (R, 4D+2V)
        q, q_rot = qkvg[:, 0:D], qkvg[:, D:2 * D]
        k, k_rot = qkvg[:, 2 * D:3 * D], qkvg[:, 3 * D:4 * D]
        v = qkvg[:, 4 * D:4 * D + V]
        g = qkvg[:, 4 * D + V:4 * D + 2 * V]
        qr = q * cos + q_rot * sin                  # theta_shift (rotate folded into weights)
        kr = k * cos + k_rot * sin

        heads = []
        for hh in range(NUM_HEADS):                                      # static unroll (2)
            qh = qr[:, hh * KEY_DIM:(hh + 1) * KEY_DIM].astype(jnp.bfloat16)
            kh = kr[:, hh * KEY_DIM:(hh + 1) * KEY_DIM].astype(jnp.bfloat16)
            vh = v[:, hh * HEAD_DIM:(hh + 1) * HEAD_DIM].astype(jnp.bfloat16)
            # q @ k^T without explicit transpose: contract last dims directly.
            qk = jax.lax.dot_general(qh, kh, (((1,), (1,)), ((), ())),
                                     preferred_element_type=jnp.float32)  # (R, R)
            # block-diagonal (over batch) decay mask -> cross-batch scores are exactly 0
            qk = qk * mask_ref[hh]
            qk = qk / jnp.maximum(jnp.sum(jnp.abs(qk), axis=-1, keepdims=True), 1.0)
            oh = jnp.dot(qk.astype(jnp.bfloat16), vh,
                         preferred_element_type=jnp.float32)              # (R, Dv)
            heads.append(rms(oh))                   # per-head RMS group-norm (no affine)
        ret = jnp.concatenate(heads, axis=-1)                             # (R, V)
        gated = (g * jax.nn.sigmoid(g)) * ret                             # swish(g) * out
        x = x + mm(gated, w_out_ref[l])

        # ----- GLU FFN sublayer (pre-norm) -----
        hn = rms(x) * fn_w_ref[l]
        hg = mm(hn, w_ffn1g_ref[l])                                       # (R, 2F) = [fc1|gate]
        h1, gt = hg[:, :FFN_DIM], hg[:, FFN_DIM:]
        act = (h1 * jax.nn.sigmoid(h1)) * gt                              # swish(fc1) * gate
        x = x + mm(act, w_ffn2_ref[l])
        hidden_states.append(x)

    # ----- final RMSNorm + fused (padded, lane-dense) logits projection -----
    xn = rms(x) * lnf_ref[...]
    logits_ref[...] = mm(xn, w_log_ref[...])                              # (R, 128)

    # inner_states as one lane-dense 128-wide slab: [ x0 | x1 | x2 | 0-pad ]
    pad = HIDDEN_PAD - HIDDEN_COLS
    if pad > 0:
        hidden_states = hidden_states + [jnp.zeros((ROWS, pad), jnp.float32)]
    hid_ref[...] = jnp.concatenate(hidden_states, axis=-1)


def pallas_retnet_forward(tok_flat, p, eps=LAYERNORM_EPS):
    """tok_flat: (B*T, 3) int32.  All weights / tables resident in VMEM; grid=(1,)."""
    L = NUM_LAYERS
    return pl.pallas_call(
        functools.partial(_retnet_forward_kernel, eps=eps),
        out_shape=(jax.ShapeDtypeStruct((ROWS, LOGITS_PAD), jnp.float32),
                   jax.ShapeDtypeStruct((ROWS, HIDDEN_PAD), jnp.float32)),
        grid=(1,),
        in_specs=[
            pl.BlockSpec((ROWS, len(N_TOKENS)), lambda i: (0, 0)),        # token ids
            pl.BlockSpec((TOTAL_TOKENS, EMBED_DIM), lambda i: (0, 0)),    # fused embed table
            pl.BlockSpec((1, EMBED_DIM), lambda i: (0, 0)),               # layernorm_embedding
            pl.BlockSpec((ROWS, EMBED_DIM), lambda i: (0, 0)),            # sin (batch-tiled)
            pl.BlockSpec((ROWS, EMBED_DIM), lambda i: (0, 0)),            # cos
            pl.BlockSpec((NUM_HEADS, ROWS, ROWS), lambda i: (0, 0, 0)),   # block-diag decay mask
            pl.BlockSpec((L, 1, EMBED_DIM), lambda i: (0, 0, 0)),         # retention RMSNorm w
            pl.BlockSpec((L, EMBED_DIM, QKVG_COLS), lambda i: (0, 0, 0)),  # fused qkvg (bf16)
            pl.BlockSpec((L, VALUE_DIM, EMBED_DIM), lambda i: (0, 0, 0)),  # out_proj (bf16)
            pl.BlockSpec((L, 1, EMBED_DIM), lambda i: (0, 0, 0)),         # final RMSNorm w
            pl.BlockSpec((L, EMBED_DIM, 2 * FFN_DIM), lambda i: (0, 0, 0)),  # fc1|gate (bf16)
            pl.BlockSpec((L, FFN_DIM, EMBED_DIM), lambda i: (0, 0, 0)),   # fc2 (bf16)
            pl.BlockSpec((1, EMBED_DIM), lambda i: (0, 0)),               # decoder layer_norm
            pl.BlockSpec((EMBED_DIM, LOGITS_PAD), lambda i: (0, 0)),      # padded logits (bf16)
        ],
        out_specs=(pl.BlockSpec((ROWS, LOGITS_PAD), lambda i: (0, 0)),
                   pl.BlockSpec((ROWS, HIDDEN_PAD), lambda i: (0, 0))),
    )(tok_flat, p["emb_table"], p["layernorm_embedding"], p["sin"], p["cos"], p["mask"],
      p["retention_norm"], p["w_qkvg"], p["out_proj"],
      p["final_norm"], p["w_ffn1g"], p["ffn_fc2"],
      p["layer_norm"], p["output_projection"])


# ------------------------------------- glue (JAX) --------------------------------------
def build_rel_pos(slen, batch):
    """RetNetRelPos parallel branch, precomputed ONCE (head-tiled, batch-tiled,
    batch-block-diagonal decay mask so cross-batch retention is exactly zero)."""
    half = KEY_DIM // 2
    angle = 1.0 / (10000.0 ** jnp.linspace(0.0, 1.0, half))
    angle = jnp.repeat(angle[:, None], 2, axis=1).reshape(-1)            # (KEY_DIM,)
    decay = jnp.log(1.0 - 2.0 ** (-5.0 - jnp.arange(NUM_HEADS, dtype=jnp.float32)))
    index = jnp.arange(slen, dtype=jnp.float32)
    sin = jnp.sin(index[:, None] * angle[None, :])                       # (T, KEY_DIM)
    cos = jnp.cos(index[:, None] * angle[None, :])
    diff = index[:, None] - index[None, :]
    masked = jnp.where(diff >= 0.0, diff, jnp.inf)                       # ~tril -> +inf
    mask = jnp.exp(masked[None] * decay[:, None, None])                  # (H, T, T)
    mask = jnp.nan_to_num(mask)
    mask = mask / jnp.sqrt(jnp.sum(mask, axis=-1, keepdims=True))
    # tile rotary tables per head (contiguous lane blocks) and over the folded batch rows
    sin_bt = jnp.tile(jnp.tile(sin, (1, NUM_HEADS)), (batch, 1))         # (B*T, D)
    cos_bt = jnp.tile(jnp.tile(cos, (1, NUM_HEADS)), (batch, 1))
    rows = batch * slen
    mask_bd = jnp.zeros((NUM_HEADS, rows, rows), jnp.float32)
    for b in range(batch):
        mask_bd = mask_bd.at[:, b * slen:(b + 1) * slen, b * slen:(b + 1) * slen].set(mask)
    return sin_bt, cos_bt, mask_bd


def rotate_pairs_matrix(dim):
    """(dim, dim) matrix R s.t. x @ R == rotate_every_two(x) (adjacent-pair rotation)."""
    i = jnp.arange(dim)
    cols = i + 1 - 2 * (i % 2)                     # even -> i+1, odd -> i-1
    vals = jnp.where(i % 2 == 0, 1.0, -1.0)        # out[2m+1]=x[2m], out[2m]=-x[2m+1]
    return jnp.zeros((dim, dim), jnp.float32).at[i, cols].set(vals)


def retnet_decoder_forward(params, tokens):
    """tokens: (B, T, n_streams) int32 -> ([logits per token stream], aux dict)."""
    B, T, S = tokens.shape
    tok_flat = tokens.reshape(B * T, S)
    logits_flat, hid_flat = pallas_retnet_forward(tok_flat, params)      # single kernel launch

    logits, off = [], 0
    for n in N_TOKENS:
        logits.append(logits_flat[:, off:off + n].reshape(B, T, n))
        off += n
    inner_states = [hid_flat[:, l * EMBED_DIM:(l + 1) * EMBED_DIM].reshape(B, T, EMBED_DIM)
                    for l in range(NUM_LAYERS + 1)]
    # TODO(synk): incremental_state / chunkwise_recurrent / MoE / prompt branches not exercised
    return logits, {"inner_states": inner_states, "l_aux": [None] * NUM_LAYERS, "attn": None}


def init_raw_params(key):
    """Parameters mirroring the PyTorch module layout (weights as (in, out))."""
    std = EMBED_DIM ** -0.5
    keys = iter(jax.random.split(key, 8 * NUM_LAYERS + 2 * len(N_TOKENS) + 4))
    params = {
        "embed_tokens": [jax.random.normal(next(keys), (n, EMBED_DIM), jnp.float32) * std
                         for n in N_TOKENS],
        "layernorm_embedding": jnp.ones((1, EMBED_DIM), jnp.float32),
        "layer_norm": jnp.ones((1, EMBED_DIM), jnp.float32),
        "output_projection": [jax.random.normal(next(keys), (EMBED_DIM, n), jnp.float32) * std
                              for n in N_TOKENS],
        "layers": [],
    }
    for _ in range(NUM_LAYERS):
        lp = {
            "retention_norm": jnp.ones((1, EMBED_DIM), jnp.float32),
            "final_norm": jnp.ones((1, EMBED_DIM), jnp.float32),
            "q_proj": jax.random.normal(next(keys), (EMBED_DIM, EMBED_DIM), jnp.float32) * std,
            "k_proj": jax.random.normal(next(keys), (EMBED_DIM, EMBED_DIM), jnp.float32) * std,
            "v_proj": jax.random.normal(next(keys), (EMBED_DIM, VALUE_DIM), jnp.float32) * std,
            "g_proj": jax.random.normal(next(keys), (EMBED_DIM, VALUE_DIM), jnp.float32) * std,
            "out_proj": jax.random.normal(next(keys), (VALUE_DIM, EMBED_DIM), jnp.float32) * std,
            "ffn_fc1": jax.random.normal(next(keys), (EMBED_DIM, FFN_DIM), jnp.float32) * std,
            "ffn_gate": jax.random.normal(next(keys), (EMBED_DIM, FFN_DIM), jnp.float32) * std,
            "ffn_fc2": jax.random.normal(next(keys), (FFN_DIM, EMBED_DIM), jnp.float32) * (FFN_DIM ** -0.5),
        }
        params["layers"].append(lp)
    return params


def fuse_params(raw):
    """One-time (outside jit) fusion: layer weights stacked on a leading L axis,
    rotation + k-scaling + fc1|gate + logits fused into lane-dense bf16 slabs,
    embedding tables concatenated, rel-pos tables precomputed."""
    R = rotate_pairs_matrix(EMBED_DIM)
    w_qkvg, out_proj, w_ffn1g, ffn_fc2, rn_w, fn_w = [], [], [], [], [], []
    for lp in raw["layers"]:
        wq = lp["q_proj"]
        wk = lp["k_proj"] * SCALING                            # fold k scaling into the weight
        w_qkvg.append(jnp.concatenate(
            [wq, wq @ R, wk, wk @ R, lp["v_proj"], lp["g_proj"]], axis=1))   # (D, 4D+2V)
        out_proj.append(lp["out_proj"])
        w_ffn1g.append(jnp.concatenate([lp["ffn_fc1"], lp["ffn_gate"]], axis=1))
        ffn_fc2.append(lp["ffn_fc2"])
        rn_w.append(lp["retention_norm"])
        fn_w.append(lp["final_norm"])
    w_log = jnp.concatenate(raw["output_projection"], axis=1)              # (D, sum(n))
    w_log = jnp.pad(w_log, ((0, 0), (0, LOGITS_PAD - w_log.shape[1])))     # -> (D, 128)
    sin_bt, cos_bt, mask_bd = build_rel_pos(SEQ, BATCH)
    bf16 = jnp.bfloat16
    return {
        "emb_table": jnp.concatenate(raw["embed_tokens"], axis=0),         # (51, D) f32
        "layernorm_embedding": raw["layernorm_embedding"],
        "layer_norm": raw["layer_norm"],
        "output_projection": w_log.astype(bf16),
        "retention_norm": jnp.stack(rn_w),                                 # (L, 1, D) f32
        "final_norm": jnp.stack(fn_w),
        "w_qkvg": jnp.stack(w_qkvg).astype(bf16),                          # (L, D, 192)
        "out_proj": jnp.stack(out_proj).astype(bf16),                      # (L, V, D)
        "w_ffn1g": jnp.stack(w_ffn1g).astype(bf16),                        # (L, D, 128)
        "ffn_fc2": jnp.stack(ffn_fc2).astype(bf16),                        # (L, F, D)
        "sin": sin_bt, "cos": cos_bt, "mask": mask_bd,
    }


if __name__ == "__main__":
    root = jax.random.PRNGKey(0)
    pkey, tkey = jax.random.split(root)
    params = fuse_params(init_raw_params(pkey))

    # one token id per stream at every position: (B, T, n_streams)
    tkeys = jax.random.split(tkey, len(N_TOKENS))
    tokens = jnp.stack(
        [jax.random.randint(tkeys[i], (BATCH, SEQ), 0, N_TOKENS[i], dtype=jnp.int32)
         for i in range(len(N_TOKENS))], axis=-1)

    fwd = jax.jit(retnet_decoder_forward)
    logits, aux = fwd(params, tokens)
    logits = jax.block_until_ready(logits)

    assert len(logits) == len(N_TOKENS)
    for lg, n in zip(logits, N_TOKENS):
        assert lg.shape == (BATCH, SEQ, n)
        assert bool(jnp.all(jnp.isfinite(lg)))
    assert len(aux["inner_states"]) == NUM_LAYERS + 1
    for hs in aux["inner_states"]:
        assert hs.shape == (BATCH, SEQ, EMBED_DIM)
        assert bool(jnp.all(jnp.isfinite(hs)))
    print("KERNEL_OK")
</pallas_src>

<mosaic_0001>
module attributes {stable_mosaic.version = 11 : i64} {
  func.func @_retnet_forward_kernel(%arg0: i32, %arg1: memref<16x3xi32, #tpu.memory_space<vmem>>, %arg2: memref<51x32xf32, #tpu.memory_space<vmem>>, %arg3: memref<1x32xf32, #tpu.memory_space<vmem>>, %arg4: memref<16x32xf32, #tpu.memory_space<vmem>>, %arg5: memref<16x32xf32, #tpu.memory_space<vmem>>, %arg6: memref<2x16x16xf32, #tpu.memory_space<vmem>>, %arg7: memref<2x1x32xf32, #tpu.memory_space<vmem>>, %arg8: memref<2x32x192xbf16, #tpu.memory_space<vmem>>, %arg9: memref<2x32x32xbf16, #tpu.memory_space<vmem>>, %arg10: memref<2x1x32xf32, #tpu.memory_space<vmem>>, %arg11: memref<2x32x128xbf16, #tpu.memory_space<vmem>>, %arg12: memref<2x64x32xbf16, #tpu.memory_space<vmem>>, %arg13: memref<1x32xf32, #tpu.memory_space<vmem>>, %arg14: memref<32x128xbf16, #tpu.memory_space<vmem>>, %arg15: memref<16x128xf32, #tpu.memory_space<vmem>>, %arg16: memref<16x128xf32, #tpu.memory_space<vmem>>) attributes {dimension_semantics = [#tpu.dimension_semantics<arbitrary>], iteration_bounds = array<i64: 1>, scalar_prefetch = 0 : i64, scratch_operands = 0 : i64, tpu.core_type = #tpu.core_type<tc>, window_params = [{pipeline_mode = #tpu.pipeline_mode<synchronous>, transform_indices = @transform_0, window_bounds = array<i64: 16, 3>}, {pipeline_mode = #tpu.pipeline_mode<synchronous>, transform_indices = @transform_1, window_bounds = array<i64: 51, 32>}, {pipeline_mode = #tpu.pipeline_mode<synchronous>, transform_indices = @transform_2, window_bounds = array<i64: 1, 32>}, {pipeline_mode = #tpu.pipeline_mode<synchronous>, transform_indices = @transform_3, window_bounds = array<i64: 16, 32>}, {pipeline_mode = #tpu.pipeline_mode<synchronous>, transform_indices = @transform_4, window_bounds = array<i64: 16, 32>}, {pipeline_mode = #tpu.pipeline_mode<synchronous>, transform_indices = @transform_5, window_bounds = array<i64: 2, 16, 16>}, {pipeline_mode = #tpu.pipeline_mode<synchronous>, transform_indices = @transform_6, window_bounds = array<i64: 2, 1, 32>}, {pipeline_mode = #tpu.pipeline_mode<synchronous>, transform_indices = @transform_7, window_bounds = array<i64: 2, 32, 192>}, {pipeline_mode = #tpu.pipeline_mode<synchronous>, transform_indices = @transform_8, window_bounds = array<i64: 2, 32, 32>}, {pipeline_mode = #tpu.pipeline_mode<synchronous>, transform_indices = @transform_9, window_bounds = array<i64: 2, 1, 32>}, {pipeline_mode = #tpu.pipeline_mode<synchronous>, transform_indices = @transform_10, window_bounds = array<i64: 2, 32, 128>}, {pipeline_mode = #tpu.pipeline_mode<synchronous>, transform_indices = @transform_11, window_bounds = array<i64: 2, 64, 32>}, {pipeline_mode = #tpu.pipeline_mode<synchronous>, transform_indices = @transform_12, window_bounds = array<i64: 1, 32>}, {pipeline_mode = #tpu.pipeline_mode<synchronous>, transform_indices = @transform_13, window_bounds = array<i64: 32, 128>}, {pipeline_mode = #tpu.pipeline_mode<synchronous>, transform_indices = @transform_14, window_bounds = array<i64: 16, 128>}, {pipeline_mode = #tpu.pipeline_mode<synchronous>, transform_indices = @transform_15, window_bounds = array<i64: 16, 128>}]} {
    %c0 = arith.constant 0 : index
    %c0_0 = arith.constant 0 : index
    %0 = vector.load %arg1[%c0, %c0_0] : memref<16x3xi32, #tpu.memory_space<vmem>>, vector<16x3xi32>
    %1 = tpu.iota {dimensions = array<i32: 1>} : vector<16x51xi32>
    %cst = arith.constant 0.000000e+00 : f32
    %2 = vector.broadcast %cst : f32 to vector<16x51xf32>
    %3 = vector.extract_strided_slice %0 {offsets = [0, 0], sizes = [16, 1], strides = [1, 1]} : vector<16x3xi32> to vector<16x1xi32>
    %c0_i32 = arith.constant 0 : i32
    %4 = vector.broadcast %c0_i32 : i32 to vector<16x1xi32>
    %5 = arith.addi %3, %4 : vector<16x1xi32>
    %6 = vector.broadcast %5 : vector<16x1xi32> to vector<16x51xi32>
    %7 = arith.cmpi eq, %1, %6 : vector<16x51xi32>
    %8 = arith.extui %7 : vector<16x51xi1> to vector<16x51xi32>
    %9 = arith.sitofp %8 : vector<16x51xi32> to vector<16x51xf32>
    %10 = arith.addf %2, %9 : vector<16x51xf32>
    %11 = vector.extract_strided_slice %0 {offsets = [0, 1], sizes = [16, 1], strides = [1, 1]} : vector<16x3xi32> to vector<16x1xi32>
    %c17_i32 = arith.constant 17 : i32
    %12 = vector.broadcast %c17_i32 : i32 to vector<16x1xi32>
    %13 = arith.addi %11, %12 : vector<16x1xi32>
    %14 = vector.broadcast %13 : vector<16x1xi32> to vector<16x51xi32>
    %15 = arith.cmpi eq, %1, %14 : vector<16x51xi32>
    %16 = arith.extui %15 : vector<16x51xi1> to vector<16x51xi32>
    %17 = arith.sitofp %16 : vector<16x51xi32> to vector<16x51xf32>
    %18 = arith.addf %10, %17 : vector<16x51xf32>
    %19 = vector.extract_strided_slice %0 {offsets = [0, 2], sizes = [16, 1], strides = [1, 1]} : vector<16x3xi32> to vector<16x1xi32>
    %c40_i32 = arith.constant 40 : i32
    %20 = vector.broadcast %c40_i32 : i32 to vector<16x1xi32>
    %21 = arith.addi %19, %20 : vector<16x1xi32>
    %22 = vector.broadcast %21 : vector<16x1xi32> to vector<16x51xi32>
    %23 = arith.cmpi eq, %1, %22 : vector<16x51xi32>
    %24 = arith.extui %23 : vector<16x51xi1> to vector<16x51xi32>
    %25 = arith.sitofp %24 : vector<16x51xi32> to vector<16x51xf32>
    %26 = arith.addf %18, %25 : vector<16x51xf32>
    %c0_1 = arith.constant 0 : index
    %c0_2 = arith.constant 0 : index
    %27 = vector.load %arg2[%c0_1, %c0_2] : memref<51x32xf32, #tpu.memory_space<vmem>>, vector<51x32xf32>
    %cst_3 = arith.constant dense<0.000000e+00> : vector<16x32xf32>
    %28 = tpu.matmul %26, %27, %cst_3 {dimension_numbers = #tpu.dot_dimension_numbers<[1], [0], [0], [1], [0, 0, 1, 1], [], []>} : vector<16x51xf32>, vector<51x32xf32>, vector<16x32xf32> -> vector<16x32xf32>
    %cst_4 = arith.constant 5.65685415 : f32
    %29 = vector.broadcast %cst_4 : f32 to vector<16x32xf32>
    %30 = arith.mulf %29, %28 : vector<16x32xf32>
    %31 = arith.mulf %30, %30 : vector<16x32xf32>
    %cst_5 = arith.constant dense<0.000000e+00> : vector<16xf32>
    %32 = vector.multi_reduction <add>, %31, %cst_5 [1] : vector<16x32xf32> to vector<16xf32>
    %33 = vector.shape_cast %32 : vector<16xf32> to vector<16x1xf32>
    %cst_6 = arith.constant 3.200000e+01 : f32
    %34 = vector.broadcast %cst_6 : f32 to vector<16x1xf32>
    %35 = arith.divf %33, %34 : vector<16x1xf32>
    %cst_7 = arith.constant 9.99999974E-6 : f32
    %36 = vector.broadcast %cst_7 : f32 to vector<16x1xf32>
    %37 = arith.addf %35, %36 : vector<16x1xf32>
    %38 = math.rsqrt %37 : vector<16x1xf32>
    %39 = vector.broadcast %38 : vector<16x1xf32> to vector<16x32xf32>
    %40 = arith.mulf %30, %39 : vector<16x32xf32>
    %c0_8 = arith.constant 0 : index
    %c0_9 = arith.constant 0 : index
    %41 = vector.load %arg3[%c0_8, %c0_9] : memref<1x32xf32, #tpu.memory_space<vmem>>, vector<1x32xf32>
    %42 = vector.broadcast %41 : vector<1x32xf32> to vector<16x32xf32>
    %43 = arith.mulf %40, %42 : vector<16x32xf32>
    %c0_10 = arith.constant 0 : index
    %c0_11 = arith.constant 0 : index
    %44 = vector.load %arg4[%c0_10, %c0_11] : memref<16x32xf32, #tpu.memory_space<vmem>>, vector<16x32xf32>
    %c0_12 = arith.constant 0 : index
    %c0_13 = arith.constant 0 : index
    %45 = vector.load %arg5[%c0_12, %c0_13] : memref<16x32xf32, #tpu.memory_space<vmem>>, vector<16x32xf32>
    %46 = arith.mulf %43, %43 : vector<16x32xf32>
    %cst_14 = arith.constant dense<0.000000e+00> : vector<16xf32>
    %47 = vector.multi_reduction <add>, %46, %cst_14 [1] : vector<16x32xf32> to vector<16xf32>
    %48 = vector.shape_cast %47 : vector<16xf32> to vector<16x1xf32>
    %cst_15 = arith.constant 3.200000e+01 : f32
    %49 = vector.broadcast %cst_15 : f32 to vector<16x1xf32>
    %50 = arith.divf %48, %49 : vector<16x1xf32>
    %cst_16 = arith.constant 9.99999974E-6 : f32
    %51 = vector.broadcast %cst_16 : f32 to vector<16x1xf32>
    %52 = arith.addf %50, %51 : vector<16x1xf32>
    %53 = math.rsqrt %52 : vector<16x1xf32>
    %54 = vector.broadcast %53 : vector<16x1xf32> to vector<16x32xf32>
    %55 = arith.mulf %43, %54 : vector<16x32xf32>
    %c0_17 = arith.constant 0 : index
    %c0_18 = arith.constant 0 : index
    %c0_19 = arith.constant 0 : index
    %56 = vector.load %arg7[%c0_17, %c0_18, %c0_19] : memref<2x1x32xf32, #tpu.memory_space<vmem>>, vector<1x1x32xf32>
    %57 = vector.shape_cast %56 : vector<1x1x32xf32> to vector<1x32xf32>
    %58 = vector.broadcast %57 : vector<1x32xf32> to vector<16x32xf32>
    %59 = arith.mulf %55, %58 : vector<16x32xf32>
    %c0_20 = arith.constant 0 : index
    %c0_21 = arith.constant 0 : index
    %c0_22 = arith.constant 0 : index
    %60 = vector.load %arg8[%c0_20, %c0_21, %c0_22] : memref<2x32x192xbf16, #tpu.memory_space<vmem>>, vector<1x32x192xbf16>
    %61 = vector.shape_cast %60 : vector<1x32x192xbf16> to vector<32x192xbf16>
    %62 = arith.truncf %59 : vector<16x32xf32> to vector<16x32xbf16>
    %cst_23 = arith.constant dense<0.000000e+00> : vector<16x192xf32>
    %63 = tpu.matmul %62, %61, %cst_23 {dimension_numbers = #tpu.dot_dimension_numbers<[1], [0], [0], [1], [0, 0, 1, 1], [], []>} : vector<16x32xbf16>, vector<32x192xbf16>, vector<16x192xf32> -> vector<16x192xf32>
    %64 = vector.extract_strided_slice %63 {offsets = [0, 0], sizes = [16, 32], strides = [1, 1]} : vector<16x192xf32> to vector<16x32xf32>
    %65 = vector.extract_strided_slice %63 {offsets = [0, 32], sizes = [16, 32], strides = [1, 1]} : vector<16x192xf32> to vector<16x32xf32>
    %66 = vector.extract_strided_slice %63 {offsets = [0, 64], sizes = [16, 32], strides = [1, 1]} : vector<16x192xf32> to vector<16x32xf32>
    %67 = vector.extract_strided_slice %63 {offsets = [0, 96], sizes = [16, 32], strides = [1, 1]} : vector<16x192xf32> to vector<16x32xf32>
    %68 = vector.extract_strided_slice %63 {offsets = [0, 128], sizes = [16, 32], strides = [1, 1]} : vector<16x192xf32> to vector<16x32xf32>
    %69 = vector.extract_strided_slice %63 {offsets = [0, 160], sizes = [16, 32], strides = [1, 1]} : vector<16x192xf32> to vector<16x32xf32>
    %70 = arith.mulf %64, %45 : vector<16x32xf32>
    %71 = arith.mulf %65, %44 : vector<16x32xf32>
    %72 = arith.addf %70, %71 : vector<16x32xf32>
    %73 = arith.mulf %66, %45 : vector<16x32xf32>
    %74 = arith.mulf %67, %44 : vector<16x32xf32>
    %75 = arith.addf %73, %74 : vector<16x32xf32>
    %76 = vector.extract_strided_slice %72 {offsets = [0, 0], sizes = [16, 16], strides = [1, 1]} : vector<16x32xf32> to vector<16x16xf32>
    %77 = arith.truncf %76 : vector<16x16xf32> to vector<16x16xbf16>
    %78 = vector.extract_strided_slice %75 {offsets = [0, 0], sizes = [16, 16], strides = [1, 1]} : vector<16x32xf32> to vector<16x16xf32>
    %79 = arith.truncf %78 : vector<16x16xf32> to vector<16x16xbf16>
    %80 = vector.extract_strided_slice %68 {offsets = [0, 0], sizes = [16, 16], strides = [1, 1]} : vector<16x32xf32> to vector<16x16xf32>
    %81 = arith.truncf %80 : vector<16x16xf32> to vector<16x16xbf16>
    %cst_24 = arith.constant dense<0.000000e+00> : vector<16x16xf32>
    %82 = tpu.matmul %77, %79, %cst_24 {dimension_numbers = #tpu.dot_dimension_numbers<[1], [1], [0], [0], [0, 0, 1, 0], [], []>} : vector<16x16xbf16>, vector<16x16xbf16>, vector<16x16xf32> -> vector<16x16xf32>
    %c0_25 = arith.constant 0 : index
    %c0_26 = arith.constant 0 : index
    %c0_27 = arith.constant 0 : index
    %83 = vector.load %arg6[%c0_25, %c0_26, %c0_27] : memref<2x16x16xf32, #tpu.memory_space<vmem>>, vector<1x16x16xf32>
    %84 = vector.shape_cast %83 : vector<1x16x16xf32> to vector<16x16xf32>
    %85 = arith.mulf %82, %84 : vector<16x16xf32>
    %86 = math.absf %85 : vector<16x16xf32>
    %cst_28 = arith.constant dense<0.000000e+00> : vector<16xf32>
    %87 = vector.multi_reduction <add>, %86, %cst_28 [1] : vector<16x16xf32> to vector<16xf32>
    %88 = vector.shape_cast %87 : vector<16xf32> to vector<16x1xf32>
    %cst_29 = arith.constant 1.000000e+00 : f32
    %89 = vector.broadcast %cst_29 : f32 to vector<16x1xf32>
    %90 = arith.maximumf %88, %89 : vector<16x1xf32>
    %91 = vector.broadcast %90 : vector<16x1xf32> to vector<16x16xf32>
    %92 = arith.divf %85, %91 : vector<16x16xf32>
    %93 = arith.truncf %92 : vector<16x16xf32> to vector<16x16xbf16>
    %cst_30 = arith.constant dense<0.000000e+00> : vector<16x16xf32>
    %94 = tpu.matmul %93, %81, %cst_30 {dimension_numbers = #tpu.dot_dimension_numbers<[1], [0], [0], [1], [0, 0, 1, 1], [], []>} : vector<16x16xbf16>, vector<16x16xbf16>, vector<16x16xf32> -> vector<16x16xf32>
    %95 = arith.mulf %94, %94 : vector<16x16xf32>
    %cst_31 = arith.constant dense<0.000000e+00> : vector<16xf32>
    %96 = vector.multi_reduction <add>, %95, %cst_31 [1] : vector<16x16xf32> to vector<16xf32>
    %97 = vector.shape_cast %96 : vector<16xf32> to vector<16x1xf32>
    %cst_32 = arith.constant 1.600000e+01 : f32
    %98 = vector.broadcast %cst_32 : f32 to vector<16x1xf32>
    %99 = arith.divf %97, %98 : vector<16x1xf32>
    %cst_33 = arith.constant 9.99999974E-6 : f32
    %100 = vector.broadcast %cst_33 : f32 to vector<16x1xf32>
    %101 = arith.addf %99, %100 : vector<16x1xf32>
    %102 = math.rsqrt %101 : vector<16x1xf32>
    %103 = vector.broadcast %102 : vector<16x1xf32> to vector<16x16xf32>
    %104 = arith.mulf %94, %103 : vector<16x16xf32>
    %105 = vector.extract_strided_slice %72 {offsets = [0, 16], sizes = [16, 16], strides = [1, 1]} : vector<16x32xf32> to vector<16x16xf32>
    %106 = arith.truncf %105 : vector<16x16xf32> to vector<16x16xbf16>
    %107 = vector.extract_strided_slice %75 {offsets = [0, 16], sizes = [16, 16], strides = [1, 1]} : vector<16x32xf32> to vector<16x16xf32>
    %108 = arith.truncf %107 : vector<16x16xf32> to vector<16x16xbf16>
    %109 = vector.extract_strided_slice %68 {offsets = [0, 16], sizes = [16, 16], strides = [1, 1]} : vector<16x32xf32> to vector<16x16xf32>
    %110 = arith.truncf %109 : vector<16x16xf32> to vector<16x16xbf16>
    %cst_34 = arith.constant dense<0.000000e+00> : vector<16x16xf32>
    %111 = tpu.matmul %106, %108, %cst_34 {dimension_numbers = #tpu.dot_dimension_numbers<[1], [1], [0], [0], [0, 0, 1, 0], [], []>} : vector<16x16xbf16>, vector<16x16xbf16>, vector<16x16xf32> -> vector<16x16xf32>
    %c1 = arith.constant 1 : index
    %c0_35 = arith.constant 0 : index
    %c0_36 = arith.constant 0 : index
    %112 = vector.load %arg6[%c1, %c0_35, %c0_36] : memref<2x16x16xf32, #tpu.memory_space<vmem>>, vector<1x16x16xf32>
    %113 = vector.shape_cast %112 : vector<1x16x16xf32> to vector<16x16xf32>
    %114 = arith.mulf %111, %113 : vector<16x16xf32>
    %115 = math.absf %114 : vector<16x16xf32>
    %cst_37 = arith.constant dense<0.000000e+00> : vector<16xf32>
    %116 = vector.multi_reduction <add>, %115, %cst_37 [1] : vector<16x16xf32> to vector<16xf32>
    %117 = vector.shape_cast %116 : vector<16xf32> to vector<16x1xf32>
    %cst_38 = arith.constant 1.000000e+00 : f32
    %118 = vector.broadcast %cst_38 : f32 to vector<16x1xf32>
    %119 = arith.maximumf %117, %118 : vector<16x1xf32>
    %120 = vector.broadcast %119 : vector<16x1xf32> to vector<16x16xf32>
    %121 = arith.divf %114, %120 : vector<16x16xf32>
    %122 = arith.truncf %121 : vector<16x16xf32> to vector<16x16xbf16>
    %cst_39 = arith.constant dense<0.000000e+00> : vector<16x16xf32>
    %123 = tpu.matmul %122, %110, %cst_39 {dimension_numbers = #tpu.dot_dimension_numbers<[1], [0], [0], [1], [0, 0, 1, 1], [], []>} : vector<16x16xbf16>, vector<16x16xbf16>, vector<16x16xf32> -> vector<16x16xf32>
    %124 = arith.mulf %123, %123 : vector<16x16xf32>
    %cst_40 = arith.constant dense<0.000000e+00> : vector<16xf32>
    %125 = vector.multi_reduction <add>, %124, %cst_40 [1] : vector<16x16xf32> to vector<16xf32>
    %126 = vector.shape_cast %125 : vector<16xf32> to vector<16x1xf32>
    %cst_41 = arith.constant 1.600000e+01 : f32
    %127 = vector.broadcast %cst_41 : f32 to vector<16x1xf32>
    %128 = arith.divf %126, %127 : vector<16x1xf32>
    %cst_42 = arith.constant 9.99999974E-6 : f32
    %129 = vector.broadcast %cst_42 : f32 to vector<16x1xf32>
    %130 = arith.addf %128, %129 : vector<16x1xf32>
    %131 = math.rsqrt %130 : vector<16x1xf32>
    %132 = vector.broadcast %131 : vector<16x1xf32> to vector<16x16xf32>
    %133 = arith.mulf %123, %132 : vector<16x16xf32>
    %134 = tpu.concatenate %104, %133 in 1 : vector<16x16xf32>, vector<16x16xf32> -> vector<16x32xf32>
    %135 = arith.negf %69 : vector<16x32xf32>
    %136 = math.exp %135 : vector<16x32xf32>
    %cst_43 = arith.constant 1.000000e+00 : f32
    %137 = vector.broadcast %cst_43 : f32 to vector<16x32xf32>
    %138 = arith.addf %137, %136 : vector<16x32xf32>
    %139 = arith.divf %137, %138 : vector<16x32xf32>
    %140 = arith.mulf %69, %139 : vector<16x32xf32>
    %141 = arith.mulf %140, %134 : vector<16x32xf32>
    %c0_44 = arith.constant 0 : index
    %c0_45 = arith.constant 0 : index
    %c0_46 = arith.constant 0 : index
    %142 = vector.load %arg9[%c0_44, %c0_45, %c0_46] : memref<2x32x32xbf16, #tpu.memory_space<vmem>>, vector<1x32x32xbf16>
    %143 = vector.shape_cast %142 : vector<1x32x32xbf16> to vector<32x32xbf16>
    %144 = arith.truncf %141 : vector<16x32xf32> to vector<16x32xbf16>
    %cst_47 = arith.constant dense<0.000000e+00> : vector<16x32xf32>
    %145 = tpu.matmul %144, %143, %cst_47 {dimension_numbers = #tpu.dot_dimension_numbers<[1], [0], [0], [1], [0, 0, 1, 1], [], []>} : vector<16x32xbf16>, vector<32x32xbf16>, vector<16x32xf32> -> vector<16x32xf32>
    %146 = arith.addf %43, %145 : vector<16x32xf32>
    %147 = arith.mulf %146, %146 : vector<16x32xf32>
    %cst_48 = arith.constant dense<0.000000e+00> : vector<16xf32>
    %148 = vector.multi_reduction <add>, %147, %cst_48 [1] : vector<16x32xf32> to vector<16xf32>
    %149 = vector.shape_cast %148 : vector<16xf32> to vector<16x1xf32>
    %cst_49 = arith.constant 3.200000e+01 : f32
    %150 = vector.broadcast %cst_49 : f32 to vector<16x1xf32>
    %151 = arith.divf %149, %150 : vector<16x1xf32>
    %cst_50 = arith.constant 9.99999974E-6 : f32
    %152 = vector.broadcast %cst_50 : f32 to vector<16x1xf32>
    %153 = arith.addf %151, %152 : vector<16x1xf32>
    %154 = math.rsqrt %153 : vector<16x1xf32>
    %155 = vector.broadcast %154 : vector<16x1xf32> to vector<16x32xf32>
    %156 = arith.mulf %146, %155 : vector<16x32xf32>
    %c0_51 = arith.constant 0 : index
    %c0_52 = arith.constant 0 : index
    %c0_53 = arith.constant 0 : index
    %157 = vector.load %arg10[%c0_51, %c0_52, %c0_53] : memref<2x1x32xf32, #tpu.memory_space<vmem>>, vector<1x1x32xf32>
    %158 = vector.shape_cast %157 : vector<1x1x32xf32> to vector<1x32xf32>
    %159 = vector.broadcast %158 : vector<1x32xf32> to vector<16x32xf32>
    %160 = arith.mulf %156, %159 : vector<16x32xf32>
    %c0_54 = arith.constant 0 : index
    %c0_55 = arith.constant 0 : index
    %c0_56 = arith.constant 0 : index
    %161 = vector.load %arg11[%c0_54, %c0_55, %c0_56] : memref<2x32x128xbf16, #tpu.memory_space<vmem>>, vector<1x32x128xbf16>
    %162 = vector.shape_cast %161 : vector<1x32x128xbf16> to vector<32x128xbf16>
    %163 = arith.truncf %160 : vector<16x32xf32> to vector<16x32xbf16>
    %cst_57 = arith.constant dense<0.000000e+00> : vector<16x128xf32>
    %164 = tpu.matmul %163, %162, %cst_57 {dimension_numbers = #tpu.dot_dimension_numbers<[1], [0], [0], [1], [0, 0, 1, 1], [], []>} : vector<16x32xbf16>, vector<32x128xbf16>, vector<16x128xf32> -> vector<16x128xf32>
    %165 = vector.extract_strided_slice %164 {offsets = [0, 0], sizes = [16, 64], strides = [1, 1]} : vector<16x128xf32> to vector<16x64xf32>
    %166 = vector.extract_strided_slice %164 {offsets = [0, 64], sizes = [16, 64], strides = [1, 1]} : vector<16x128xf32> to vector<16x64xf32>
    %167 = arith.negf %165 : vector<16x64xf32>
    %168 = math.exp %167 : vector<16x64xf32>
    %cst_58 = arith.constant 1.000000e+00 : f32
    %169 = vector.broadcast %cst_58 : f32 to vector<16x64xf32>
    %170 = arith.addf %169, %168 : vector<16x64xf32>
    %171 = arith.divf %169, %170 : vector<16x64xf32>
    %172 = arith.mulf %165, %171 : vector<16x64xf32>
    %173 = arith.mulf %172, %166 : vector<16x64xf32>
    %c0_59 = arith.constant 0 : index
    %c0_60 = arith.constant 0 : index
    %c0_61 = arith.constant 0 : index
    %174 = vector.load %arg12[%c0_59, %c0_60, %c0_61] : memref<2x64x32xbf16, #tpu.memory_space<vmem>>, vector<1x64x32xbf16>
    %175 = vector.shape_cast %174 : vector<1x64x32xbf16> to vector<64x32xbf16>
    %176 = arith.truncf %173 : vector<16x64xf32> to vector<16x64xbf16>
    %cst_62 = arith.constant dense<0.000000e+00> : vector<16x32xf32>
    %177 = tpu.matmul %176, %175, %cst_62 {dimension_numbers = #tpu.dot_dimension_numbers<[1], [0], [0], [1], [0, 0, 1, 1], [], []>} : vector<16x64xbf16>, vector<64x32xbf16>, vector<16x32xf32> -> vector<16x32xf32>
    %178 = arith.addf %146, %177 : vector<16x32xf32>
    %179 = arith.mulf %178, %178 : vector<16x32xf32>
    %cst_63 = arith.constant dense<0.000000e+00> : vector<16xf32>
    %180 = vector.multi_reduction <add>, %179, %cst_63 [1] : vector<16x32xf32> to vector<16xf32>
    %181 = vector.shape_cast %180 : vector<16xf32> to vector<16x1xf32>
    %cst_64 = arith.constant 3.200000e+01 : f32
    %182 = vector.broadcast %cst_64 : f32 to vector<16x1xf32>
    %183 = arith.divf %181, %182 : vector<16x1xf32>
    %cst_65 = arith.constant 9.99999974E-6 : f32
    %184 = vector.broadcast %cst_65 : f32 to vector<16x1xf32>
    %185 = arith.addf %183, %184 : vector<16x1xf32>
    %186 = math.rsqrt %185 : vector<16x1xf32>
    %187 = vector.broadcast %186 : vector<16x1xf32> to vector<16x32xf32>
    %188 = arith.mulf %178, %187 : vector<16x32xf32>
    %c1_66 = arith.constant 1 : index
    %c0_67 = arith.constant 0 : index
    %c0_68 = arith.constant 0 : index
    %189 = vector.load %arg7[%c1_66, %c0_67, %c0_68] : memref<2x1x32xf32, #tpu.memory_space<vmem>>, vector<1x1x32xf32>
    %190 = vector.shape_cast %189 : vector<1x1x32xf32> to vector<1x32xf32>
    %191 = vector.broadcast %190 : vector<1x32xf32> to vector<16x32xf32>
    %192 = arith.mulf %188, %191 : vector<16x32xf32>
    %c1_69 = arith.constant 1 : index
    %c0_70 = arith.constant 0 : index
    %c0_71 = arith.constant 0 : index
    %193 = vector.load %arg8[%c1_69, %c0_70, %c0_71] : memref<2x32x192xbf16, #tpu.memory_space<vmem>>, vector<1x32x192xbf16>
    %194 = vector.shape_cast %193 : vector<1x32x192xbf16> to vector<32x192xbf16>
    %195 = arith.truncf %192 : vector<16x32xf32> to vector<16x32xbf16>
    %cst_72 = arith.constant dense<0.000000e+00> : vector<16x192xf32>
    %196 = tpu.matmul %195, %194, %cst_72 {dimension_numbers = #tpu.dot_dimension_numbers<[1], [0], [0], [1], [0, 0, 1, 1], [], []>} : vector<16x32xbf16>, vector<32x192xbf16>, vector<16x192xf32> -> vector<16x192xf32>
    %197 = vector.extract_strided_slice %196 {offsets = [0, 0], sizes = [16, 32], strides = [1, 1]} : vector<16x192xf32> to vector<16x32xf32>
    %198 = vector.extract_strided_slice %196 {offsets = [0, 32], sizes = [16, 32], strides = [1, 1]} : vector<16x192xf32> to vector<16x32xf32>
    %199 = vector.extract_strided_slice %196 {offsets = [0, 64], sizes = [16, 32], strides = [1, 1]} : vector<16x192xf32> to vector<16x32xf32>
    %200 = vector.extract_strided_slice %196 {offsets = [0, 96], sizes = [16, 32], strides = [1, 1]} : vector<16x192xf32> to vector<16x32xf32>
    %201 = vector.extract_strided_slice %196 {offsets = [0, 128], sizes = [16, 32], strides = [1, 1]} : vector<16x192xf32> to vector<16x32xf32>
    %202 = vector.extract_strided_slice %196 {offsets = [0, 160], sizes = [16, 32], strides = [1, 1]} : vector<16x192xf32> to vector<16x32xf32>
    %203 = arith.mulf %197, %45 : vector<16x32xf32>
    %204 = arith.mulf %198, %44 : vector<16x32xf32>
    %205 = arith.addf %203, %204 : vector<16x32xf32>
    %206 = arith.mulf %199, %45 : vector<16x32xf32>
    %207 = arith.mulf %200, %44 : vector<16x32xf32>
    %208 = arith.addf %206, %207 : vector<16x32xf32>
    %209 = vector.extract_strided_slice %205 {offsets = [0, 0], sizes = [16, 16], strides = [1, 1]} : vector<16x32xf32> to vector<16x16xf32>
    %210 = arith.truncf %209 : vector<16x16xf32> to vector<16x16xbf16>
    %211 = vector.extract_strided_slice %208 {offsets = [0, 0], sizes = [16, 16], strides = [1, 1]} : vector<16x32xf32> to vector<16x16xf32>
    %212 = arith.truncf %211 : vector<16x16xf32> to vector<16x16xbf16>
    %213 = vector.extract_strided_slice %201 {offsets = [0, 0], sizes = [16, 16], strides = [1, 1]} : vector<16x32xf32> to vector<16x16xf32>
    %214 = arith.truncf %213 : vector<16x16xf32> to vector<16x16xbf16>
    %cst_73 = arith.constant dense<0.000000e+00> : vector<16x16xf32>
    %215 = tpu.matmul %210, %212, %cst_73 {dimension_numbers = #tpu.dot_dimension_numbers<[1], [1], [0], [0], [0, 0, 1, 0], [], []>} : vector<16x16xbf16>, vector<16x16xbf16>, vector<16x16xf32> -> vector<16x16xf32>
    %c0_74 = arith.constant 0 : index
    %c0_75 = arith.constant 0 : index
    %c0_76 = arith.constant 0 : index
    %216 = vector.load %arg6[%c0_74, %c0_75, %c0_76] : memref<2x16x16xf32, #tpu.memory_space<vmem>>, vector<1x16x16xf32>
    %217 = vector.shape_cast %216 : vector<1x16x16xf32> to vector<16x16xf32>
    %218 = arith.mulf %215, %217 : vector<16x16xf32>
    %219 = math.absf %218 : vector<16x16xf32>
    %cst_77 = arith.constant dense<0.000000e+00> : vector<16xf32>
    %220 = vector.multi_reduction <add>, %219, %cst_77 [1] : vector<16x16xf32> to vector<16xf32>
    %221 = vector.shape_cast %220 : vector<16xf32> to vector<16x1xf32>
    %cst_78 = arith.constant 1.000000e+00 : f32
    %222 = vector.broadcast %cst_78 : f32 to vector<16x1xf32>
    %223 = arith.maximumf %221, %222 : vector<16x1xf32>
    %224 = vector.broadcast %223 : vector<16x1xf32> to vector<16x16xf32>
    %225 = arith.divf %218, %224 : vector<16x16xf32>
    %226 = arith.truncf %225 : vector<16x16xf32> to vector<16x16xbf16>
    %cst_79 = arith.constant dense<0.000000e+00> : vector<16x16xf32>
    %227 = tpu.matmul %226, %214, %cst_79 {dimension_numbers = #tpu.dot_dimension_numbers<[1], [0], [0], [1], [0, 0, 1, 1], [], []>} : vector<16x16xbf16>, vector<16x16xbf16>, vector<16x16xf32> -> vector<16x16xf32>
    %228 = arith.mulf %227, %227 : vector<16x16xf32>
    %cst_80 = arith.constant dense<0.000000e+00> : vector<16xf32>
    %229 = vector.multi_reduction <add>, %228, %cst_80 [1] : vector<16x16xf32> to vector<16xf32>
    %230 = vector.shape_cast %229 : vector<16xf32> to vector<16x1xf32>
    %cst_81 = arith.constant 1.600000e+01 : f32
    %231 = vector.broadcast %cst_81 : f32 to vector<16x1xf32>
    %232 = arith.divf %230, %231 : vector<16x1xf32>
    %cst_82 = arith.constant 9.99999974E-6 : f32
    %233 = vector.broadcast %cst_82 : f32 to vector<16x1xf32>
    %234 = arith.addf %232, %233 : vector<16x1xf32>
    %235 = math.rsqrt %234 : vector<16x1xf32>
    %236 = vector.broadcast %235 : vector<16x1xf32> to vector<16x16xf32>
    %237 = arith.mulf %227, %236 : vector<16x16xf32>
    %238 = vector.extract_strided_slice %205 {offsets = [0, 16], sizes = [16, 16], strides = [1, 1]} : vector<16x32xf32> to vector<16x16xf32>
    %239 = arith.truncf %238 : vector<16x16xf32> to vector<16x16xbf16>
    %240 = vector.extract_strided_slice %208 {offsets = [0, 16], sizes = [16, 16], strides = [1, 1]} : vector<16x32xf32> to vector<16x16xf32>
    %241 = arith.truncf %240 : vector<16x16xf32> to vector<16x16xbf16>
    %242 = vector.extract_strided_slice %201 {offsets = [0, 16], sizes = [16, 16], strides = [1, 1]} : vector<16x32xf32> to vector<16x16xf32>
    %243 = arith.truncf %242 : vector<16x16xf32> to vector<16x16xbf16>
    %cst_83 = arith.constant dense<0.000000e+00> : vector<16x16xf32>
    %244 = tpu.matmul %239, %241, %cst_83 {dimension_numbers = #tpu.dot_dimension_numbers<[1], [1], [0], [0], [0, 0, 1, 0], [], []>} : vector<16x16xbf16>, vector<16x16xbf16>, vector<16x16xf32> -> vector<16x16xf32>
    %c1_84 = arith.constant 1 : index
    %c0_85 = arith.constant 0 : index
    %c0_86 = arith.constant 0 : index
    %245 = vector.load %arg6[%c1_84, %c0_85, %c0_86] : memref<2x16x16xf32, #tpu.memory_space<vmem>>, vector<1x16x16xf32>
    %246 = vector.shape_cast %245 : vector<1x16x16xf32> to vector<16x16xf32>
    %247 = arith.mulf %244, %246 : vector<16x16xf32>
    %248 = math.absf %247 : vector<16x16xf32>
    %cst_87 = arith.constant dense<0.000000e+00> : vector<16xf32>
    %249 = vector.multi_reduction <add>, %248, %cst_87 [1] : vector<16x16xf32> to vector<16xf32>
    %250 = vector.shape_cast %249 : vector<16xf32> to vector<16x1xf32>
    %cst_88 = arith.constant 1.000000e+00 : f32
    %251 = vector.broadcast %cst_88 : f32 to vector<16x1xf32>
    %252 = arith.maximumf %250, %251 : vector<16x1xf32>
    %253 = vector.broadcast %252 : vector<16x1xf32> to vector<16x16xf32>
    %254 = arith.divf %247, %253 : vector<16x16xf32>
    %255 = arith.truncf %254 : vector<16x16xf32> to vector<16x16xbf16>
    %cst_89 = arith.constant dense<0.000000e+00> : vector<16x16xf32>
    %256 = tpu.matmul %255, %243, %cst_89 {dimension_numbers = #tpu.dot_dimension_numbers<[1], [0], [0], [1], [0, 0, 1, 1], [], []>} : vector<16x16xbf16>, vector<16x16xbf16>, vector<16x16xf32> -> vector<16x16xf32>
    %257 = arith.mulf %256, %256 : vector<16x16xf32>
    %cst_90 = arith.constant dense<0.000000e+00> : vector<16xf32>
    %258 = vector.multi_reduction <add>, %257, %cst_90 [1] : vector<16x16xf32> to vector<16xf32>
    %259 = vector.shape_cast %258 : vector<16xf32> to vector<16x1xf32>
    %cst_91 = arith.constant 1.600000e+01 : f32
    %260 = vector.broadcast %cst_91 : f32 to vector<16x1xf32>
    %261 = arith.divf %259, %260 : vector<16x1xf32>
    %cst_92 = arith.constant 9.99999974E-6 : f32
    %262 = vector.broadcast %cst_92 : f32 to vector<16x1xf32>
    %263 = arith.addf %261, %262 : vector<16x1xf32>
    %264 = math.rsqrt %263 : vector<16x1xf32>
    %265 = vector.broadcast %264 : vector<16x1xf32> to vector<16x16xf32>
    %266 = arith.mulf %256, %265 : vector<16x16xf32>
    %267 = tpu.concatenate %237, %266 in 1 : vector<16x16xf32>, vector<16x16xf32> -> vector<16x32xf32>
    %268 = arith.negf %202 : vector<16x32xf32>
    %269 = math.exp %268 : vector<16x32xf32>
    %cst_93 = arith.constant 1.000000e+00 : f32
    %270 = vector.broadcast %cst_93 : f32 to vector<16x32xf32>
    %271 = arith.addf %270, %269 : vector<16x32xf32>
    %272 = arith.divf %270, %271 : vector<16x32xf32>
    %273 = arith.mulf %202, %272 : vector<16x32xf32>
    %274 = arith.mulf %273, %267 : vector<16x32xf32>
    %c1_94 = arith.constant 1 : index
    %c0_95 = arith.constant 0 : index
    %c0_96 = arith.constant 0 : index
    %275 = vector.load %arg9[%c1_94, %c0_95, %c0_96] : memref<2x32x32xbf16, #tpu.memory_space<vmem>>, vector<1x32x32xbf16>
    %276 = vector.shape_cast %275 : vector<1x32x32xbf16> to vector<32x32xbf16>
    %277 = arith.truncf %274 : vector<16x32xf32> to vector<16x32xbf16>
    %cst_97 = arith.constant dense<0.000000e+00> : vector<16x32xf32>
    %278 = tpu.matmul %277, %276, %cst_97 {dimension_numbers = #tpu.dot_dimension_numbers<[1], [0], [0], [1], [0, 0, 1, 1], [], []>} : vector<16x32xbf16>, vector<32x32xbf16>, vector<16x32xf32> -> vector<16x32xf32>
    %279 = arith.addf %178, %278 : vector<16x32xf32>
    %280 = arith.mulf %279, %279 : vector<16x32xf32>
    %cst_98 = arith.constant dense<0.000000e+00> : vector<16xf32>
    %281 = vector.multi_reduction <add>, %280, %cst_98 [1] : vector<16x32xf32> to vector<16xf32>
    %282 = vector.shape_cast %281 : vector<16xf32> to vector<16x1xf32>
    %cst_99 = arith.constant 3.200000e+01 : f32
    %283 = vector.broadcast %cst_99 : f32 to vector<16x1xf32>
    %284 = arith.divf %282, %283 : vector<16x1xf32>
    %cst_100 = arith.constant 9.99999974E-6 : f32
    %285 = vector.broadcast %cst_100 : f32 to vector<16x1xf32>
    %286 = arith.addf %284, %285 : vector<16x1xf32>
    %287 = math.rsqrt %286 : vector<16x1xf32>
    %288 = vector.broadcast %287 : vector<16x1xf32> to vector<16x32xf32>
    %289 = arith.mulf %279, %288 : vector<16x32xf32>
    %c1_101 = arith.constant 1 : index
    %c0_102 = arith.constant 0 : index
    %c0_103 = arith.constant 0 : index
    %290 = vector.load %arg10[%c1_101, %c0_102, %c0_103] : memref<2x1x32xf32, #tpu.memory_space<vmem>>, vector<1x1x32xf32>
    %291 = vector.shape_cast %290 : vector<1x1x32xf32> to vector<1x32xf32>
    %292 = vector.broadcast %291 : vector<1x32xf32> to vector<16x32xf32>
    %293 = arith.mulf %289, %292 : vector<16x32xf32>
    %c1_104 = arith.constant 1 : index
    %c0_105 = arith.constant 0 : index
    %c0_106 = arith.constant 0 : index
    %294 = vector.load %arg11[%c1_104, %c0_105, %c0_106] : memref<2x32x128xbf16, #tpu.memory_space<vmem>>, vector<1x32x128xbf16>
    %295 = vector.shape_cast %294 : vector<1x32x128xbf16> to vector<32x128xbf16>
    %296 = arith.truncf %293 : vector<16x32xf32> to vector<16x32xbf16>
    %cst_107 = arith.constant dense<0.000000e+00> : vector<16x128xf32>
    %297 = tpu.matmul %296, %295, %cst_107 {dimension_numbers = #tpu.dot_dimension_numbers<[1], [0], [0], [1], [0, 0, 1, 1], [], []>} : vector<16x32xbf16>, vector<32x128xbf16>, vector<16x128xf32> -> vector<16x128xf32>
    %298 = vector.extract_strided_slice %297 {offsets = [0, 0], sizes = [16, 64], strides = [1, 1]} : vector<16x128xf32> to vector<16x64xf32>
    %299 = vector.extract_strided_slice %297 {offsets = [0, 64], sizes = [16, 64], strides = [1, 1]} : vector<16x128xf32> to vector<16x64xf32>
    %300 = arith.negf %298 : vector<16x64xf32>
    %301 = math.exp %300 : vector<16x64xf32>
    %cst_108 = arith.constant 1.000000e+00 : f32
    %302 = vector.broadcast %cst_108 : f32 to vector<16x64xf32>
    %303 = arith.addf %302, %301 : vector<16x64xf32>
    %304 = arith.divf %302, %303 : vector<16x64xf32>
    %305 = arith.mulf %298, %304 : vector<16x64xf32>
    %306 = arith.mulf %305, %299 : vector<16x64xf32>
    %c1_109 = arith.constant 1 : index
    %c0_110 = arith.constant 0 : index
    %c0_111 = arith.constant 0 : index
    %307 = vector.load %arg12[%c1_109, %c0_110, %c0_111] : memref<2x64x32xbf16, #tpu.memory_space<vmem>>, vector<1x64x32xbf16>
    %308 = vector.shape_cast %307 : vector<1x64x32xbf16> to vector<64x32xbf16>
    %309 = arith.truncf %306 : vector<16x64xf32> to vector<16x64xbf16>
    %cst_112 = arith.constant dense<0.000000e+00> : vector<16x32xf32>
    %310 = tpu.matmul %309, %308, %cst_112 {dimension_numbers = #tpu.dot_dimension_numbers<[1], [0], [0], [1], [0, 0, 1, 1], [], []>} : vector<16x64xbf16>, vector<64x32xbf16>, vector<16x32xf32> -> vector<16x32xf32>
    %311 = arith.addf %279, %310 : vector<16x32xf32>
    %312 = arith.mulf %311, %311 : vector<16x32xf32>
    %cst_113 = arith.constant dense<0.000000e+00> : vector<16xf32>
    %313 = vector.multi_reduction <add>, %312, %cst_113 [1] : vector<16x32xf32> to vector<16xf32>
    %314 = vector.shape_cast %313 : vector<16xf32> to vector<16x1xf32>
    %cst_114 = arith.constant 3.200000e+01 : f32
    %315 = vector.broadcast %cst_114 : f32 to vector<16x1xf32>
    %316 = arith.divf %314, %315 : vector<16x1xf32>
    %cst_115 = arith.constant 9.99999974E-6 : f32
    %317 = vector.broadcast %cst_115 : f32 to vector<16x1xf32>
    %318 = arith.addf %316, %317 : vector<16x1xf32>
    %319 = math.rsqrt %318 : vector<16x1xf32>
    %320 = vector.broadcast %319 : vector<16x1xf32> to vector<16x32xf32>
    %321 = arith.mulf %311, %320 : vector<16x32xf32>
    %c0_116 = arith.constant 0 : index
    %c0_117 = arith.constant 0 : index
    %322 = vector.load %arg13[%c0_116, %c0_117] : memref<1x32xf32, #tpu.memory_space<vmem>>, vector<1x32xf32>
    %323 = vector.broadcast %322 : vector<1x32xf32> to vector<16x32xf32>
    %324 = arith.mulf %321, %323 : vector<16x32xf32>
    %c0_118 = arith.constant 0 : index
    %c0_119 = arith.constant 0 : index
    %325 = vector.load %arg14[%c0_118, %c0_119] : memref<32x128xbf16, #tpu.memory_space<vmem>>, vector<32x128xbf16>
    %326 = arith.truncf %324 : vector<16x32xf32> to vector<16x32xbf16>
    %cst_120 = arith.constant dense<0.000000e+00> : vector<16x128xf32>
    %327 = tpu.matmul %326, %325, %cst_120 {dimension_numbers = #tpu.dot_dimension_numbers<[1], [0], [0], [1], [0, 0, 1, 1], [], []>} : vector<16x32xbf16>, vector<32x128xbf16>, vector<16x128xf32> -> vector<16x128xf32>
    %c0_121 = arith.constant 0 : index
    %c0_122 = arith.constant 0 : index
    %328 = vector.load %arg15[%c0_121, %c0_122] : memref<16x128xf32, #tpu.memory_space<vmem>>, vector<16x128xf32>
    tpu.vector_store %arg15[%c0_121, %c0_122], %327 {strides = array<i32>} : memref<16x128xf32, #tpu.memory_space<vmem>>, vector<16x128xf32>,
    %cst_123 = arith.constant 0.000000e+00 : f32
    %329 = vector.broadcast %cst_123 : f32 to vector<16x32xf32>
    %330 = tpu.concatenate %43, %178, %311, %329 in 1 : vector<16x32xf32>, vector<16x32xf32>, vector<16x32xf32>, vector<16x32xf32> -> vector<16x128xf32>
    %c0_124 = arith.constant 0 : index
    %c0_125 = arith.constant 0 : index
    %331 = vector.load %arg16[%c0_124, %c0_125] : memref<16x128xf32, #tpu.memory_space<vmem>>, vector<16x128xf32>
    tpu.vector_store %arg16[%c0_124, %c0_125], %330 {strides = array<i32>} : memref<16x128xf32, #tpu.memory_space<vmem>>, vector<16x128xf32>,
    return
  }
  func.func @transform_0(%arg0: i32) -> (i32, i32) {
    %c0_i32 = arith.constant 0 : i32
    %c0_i32_0 = arith.constant 0 : i32
    %c0_i32_1 = arith.constant 0 : i32
    return %c0_i32, %c0_i32_0 : i32, i32
  }
  func.func @transform_1(%arg0: i32) -> (i32, i32) {
    %c0_i32 = arith.constant 0 : i32
    %c0_i32_0 = arith.constant 0 : i32
    %c0_i32_1 = arith.constant 0 : i32
    return %c0_i32, %c0_i32_0 : i32, i32
  }
  func.func @transform_2(%arg0: i32) -> (i32, i32) {
    %c0_i32 = arith.constant 0 : i32
    %c0_i32_0 = arith.constant 0 : i32
    %c0_i32_1 = arith.constant 0 : i32
    return %c0_i32, %c0_i32_0 : i32, i32
  }
  func.func @transform_3(%arg0: i32) -> (i32, i32) {
    %c0_i32 = arith.constant 0 : i32
    %c0_i32_0 = arith.constant 0 : i32
    %c0_i32_1 = arith.constant 0 : i32
    return %c0_i32, %c0_i32_0 : i32, i32
  }
  func.func @transform_4(%arg0: i32) -> (i32, i32) {
    %c0_i32 = arith.constant 0 : i32
    %c0_i32_0 = arith.constant 0 : i32
    %c0_i32_1 = arith.constant 0 : i32
    return %c0_i32, %c0_i32_0 : i32, i32
  }
  func.func @transform_5(%arg0: i32) -> (i32, i32, i32) {
    %c0_i32 = arith.constant 0 : i32
    %c0_i32_0 = arith.constant 0 : i32
    %c0_i32_1 = arith.constant 0 : i32
    %c0_i32_2 = arith.constant 0 : i32
    return %c0_i32, %c0_i32_0, %c0_i32_1 : i32, i32, i32
  }
  func.func @transform_6(%arg0: i32) -> (i32, i32, i32) {
    %c0_i32 = arith.constant 0 : i32
    %c0_i32_0 = arith.constant 0 : i32
    %c0_i32_1 = arith.constant 0 : i32
    %c0_i32_2 = arith.constant 0 : i32
    return %c0_i32, %c0_i32_0, %c0_i32_1 : i32, i32, i32
  }
  func.func @transform_7(%arg0: i32) -> (i32, i32, i32) {
    %c0_i32 = arith.constant 0 : i32
    %c0_i32_0 = arith.constant 0 : i32
    %c0_i32_1 = arith.constant 0 : i32
    %c0_i32_2 = arith.constant 0 : i32
    return %c0_i32, %c0_i32_0, %c0_i32_1 : i32, i32, i32
  }
  func.func @transform_8(%arg0: i32) -> (i32, i32, i32) {
    %c0_i32 = arith.constant 0 : i32
    %c0_i32_0 = arith.constant 0 : i32
    %c0_i32_1 = arith.constant 0 : i32
    %c0_i32_2 = arith.constant 0 : i32
    return %c0_i32, %c0_i32_0, %c0_i32_1 : i32, i32, i32
  }
  func.func @transform_9(%arg0: i32) -> (i32, i32, i32) {
    %c0_i32 = arith.constant 0 : i32
    %c0_i32_0 = arith.constant 0 : i32
    %c0_i32_1 = arith.constant 0 : i32
    %c0_i32_2 = arith.constant 0 : i32
    return %c0_i32, %c0_i32_0, %c0_i32_1 : i32, i32, i32
  }
  func.func @transform_10(%arg0: i32) -> (i32, i32, i32) {
    %c0_i32 = arith.constant 0 : i32
    %c0_i32_0 = arith.constant 0 : i32
    %c0_i32_1 = arith.constant 0 : i32
    %c0_i32_2 = arith.constant 0 : i32
    return %c0_i32, %c0_i32_0, %c0_i32_1 : i32, i32, i32
  }
  func.func @transform_11(%arg0: i32) -> (i32, i32, i32) {
    %c0_i32 = arith.constant 0 : i32
    %c0_i32_0 = arith.constant 0 : i32
    %c0_i32_1 = arith.constant 0 : i32
    %c0_i32_2 = arith.constant 0 : i32
    return %c0_i32, %c0_i32_0, %c0_i32_1 : i32, i32, i32
  }
  func.func @transform_12(%arg0: i32) -> (i32, i32) {
    %c0_i32 = arith.constant 0 : i32
    %c0_i32_0 = arith.constant 0 : i32
    %c0_i32_1 = arith.constant 0 : i32
    return %c0_i32, %c0_i32_0 : i32, i32
  }
  func.func @transform_13(%arg0: i32) -> (i32, i32) {
    %c0_i32 = arith.constant 0 : i32
    %c0_i32_0 = arith.constant 0 : i32
    %c0_i32_1 = arith.constant 0 : i32
    return %c0_i32, %c0_i32_0 : i32, i32
  }
  func.func @transform_14(%arg0: i32) -> (i32, i32) {
    %c0_i32 = arith.constant 0 : i32
    %c0_i32_0 = arith.constant 0 : i32
    %c0_i32_1 = arith.constant 0 : i32
    return %c0_i32, %c0_i32_0 : i32, i32
  }
  func.func @transform_15(%arg0: i32) -> (i32, i32) {
    %c0_i32 = arith.constant 0 : i32
    %c0_i32_0 = arith.constant 0 : i32
    %c0_i32_1 = arith.constant 0 : i32
    return %c0_i32, %c0_i32_0 : i32, i32
  }
}

</mosaic_0001>

<bundles_post_ra>
// kernel: retnet_decoder_forward.1
= control target key start
LH: loop header
LB: loop body
LE: loop exit
PB: predicated region body
PF: predicated region fallthrough
CT: control target
= control target key end

     0   :  { %s2883_s0 = inlined_call_operand.vmem [shape: s32[16,3], index: 0, kind: input, shape index: {}]   ;;  %s2884_s1 = inlined_call_operand.vmem [shape: f32[51,32], index: 1, kind: input, shape index: {}]   ;;  %s2885_s2 = inlined_call_operand.hbm [shape: f32[1,32], index: 2, kind: input, shape index: {}]   ;;  %s2886_s3 = inlined_call_operand.vmem [shape: f32[16,32], index: 3, kind: input, shape index: {}]   ;;  %s2887_s4 = inlined_call_operand.hbm [shape: f32[16,32], index: 4, kind: input, shape index: {}]   ;;  %s2888_s5 = inlined_call_operand.vmem [shape: f32[2,16,16], index: 5, kind: input, shape index: {}]   ;;  %s2889_s6 = inlined_call_operand.vmem [shape: f32[2,1,32], index: 6, kind: input, shape index: {}]   ;;  %s2890_s7 = inlined_call_operand.vmem [shape: bf16[2,32,192], index: 7, kind: input, shape index: {}]   ;;  %s2891_s8 = inlined_call_operand.vmem [shape: bf16[2,32,32], index: 8, kind: input, shape index: {}]   ;;  %s2892_s9 = inlined_call_operand.hbm [shape: f32[2,1,32], index: 9, kind: input, shape index: {}]   ;;  %s2893_s10 = inlined_call_operand.vmem [shape: bf16[2,32,128], index: 10, kind: input, shape index: {}]   ;;  %s2894_s11 = inlined_call_operand.vmem [shape: bf16[2,64,32], index: 11, kind: input, shape index: {}]   ;;  %s2895_s12 = inlined_call_operand.hbm [shape: f32[1,32], index: 12, kind: input, shape index: {}]   ;;  %s2896_s13 = inlined_call_operand.vmem [shape: bf16[32,128], index: 13, kind: input, shape index: {}]   ;;  %s2897_s14 = inlined_call_operand.vmem [shape: f32[16,128], index: 14, kind: output, shape index: {0}]   ;;  %s2898_s15 = inlined_call_operand.vmem [shape: f32[16,128], index: 15, kind: output, shape index: {1}]  }
   0x1   :  { %2900 = sst [smem:[#allocation12_spill]] %s2897_s14 }
   0x2   :  { %21 = vsyncpa [#allocation3], 0 }
   0x3   :  { %22 = vsyncpa [#allocation5], 0 }
   0x4   :  { %23 = vsyncpa [#allocation8], 0  ;;  %s2305_s18 = smov [#allocation4]   ;;  %s2211_s22 = scalar_lea.hbm %s2887_s4, 256 }
   0x5   :  { %s45_s19 = sshll.u32 %s2305_s18, 4  ;;  %p2212_p0 = scmp.ne.s32.totalorder %s2887_s4, %s2211_s22  ;;  %s46_s19 = int_to_ptr.vmem [resolvable:$true] %s45_s19 }
   0x6   :  { %p2215_p1 = scmp.lt.u32.totalorder %s2211_s22, %s2887_s4 }
   0x8   :  { %p2217_p2 = pnand %p2215_p1, %p2212_p0 }
   0xa   :  { %2220 = shalt.err (!%p2217_p2)
}
   0xb   :  { %s2221_s27 = scalar_lea.vmem %s46_s19, 256  ;;  %p2226_p4 = scmp.lt.s32.totalorder %s46_s19, %s46_s19 }
   0xc   :  { %p2222_p3 = scmp.ne.s32.totalorder %s46_s19, %s2221_s27  ;;  %p2227_p5 = scmp.lt.s32.totalorder %s2221_s27, %s2221_s27 }
   0xe   :  { %p2228_p6 = por %p2227_p5, %p2226_p4 }
  0x10   :  { %p2229_p7 = pnand %p2228_p6, %p2222_p3 }
  0x12   :  { %2232 = shalt.err (!%p2229_p7)
}
  0x13   :  { %s2306_s28 = smov 128   ;;  %s2307_s29 = smov 8  }
  0x14   :  { %51 = dma.hbm_to_vmem [thread:$0]  %s2887_s4, 256, %s46_s19, [#allocation5], %s2306_s28, %s2306_s28, %s2307_s29  }
  0x15   :  { %s2308_s17 = smov [#allocation2]   ;;  %s2309_s20 = smov [#allocation6]  }
  0x16   :  { %s34_s18 = sshll.u32 %s2308_s17, 4  ;;  %s65_s21 = sshll.u32 %s2309_s20, 4  ;;  %s35_s18 = int_to_ptr.vmem [resolvable:$true] %s34_s18  ;;  %s66_s21 = int_to_ptr.vmem [resolvable:$true] %s65_s21 }
  0x17   :  { %s2233_s24 = scalar_lea.hbm %s2885_s2, 16 }
  0x18   :  { %p2234_p8 = scmp.ne.s32.totalorder %s2885_s2, %s2233_s24  ;;  %p2237_p9 = scmp.lt.u32.totalorder %s2233_s24, %s2885_s2 }
  0x1a   :  { %p2239_p10 = pnand %p2237_p9, %p2234_p8 }
  0x1c   :  { %2242 = shalt.err (!%p2239_p10)
}
  0x1d   :  { %s2243_s4 = scalar_lea.vmem %s35_s18, 16  ;;  %s2247_s19 = scalar_lea.vmem %s35_s18, 32 }
  0x1e   :  { %p2244_p11 = scmp.ne.s32.totalorder %s35_s18, %s2243_s4  ;;  %p2248_p12 = scmp.lt.s32.totalorder %s35_s18, %s35_s18 }
  0x1f   :  { %p2249_p13 = scmp.lt.s32.totalorder %s2247_s19, %s2243_s4 }
  0x21   :  { %p2250_p0 = por %p2249_p13, %p2248_p12 }
  0x23   :  { %p2251_p1 = pnand %p2250_p0, %p2244_p11 }
  0x25   :  { %2254 = shalt.err (!%p2251_p1)
}
  0x26   :  { %37 = dma.hbm_to_vmem [thread:$0]  %s2885_s2, 16, %s35_s18, [#allocation3]  }
  0x27   :  { %s2255_s14 = scalar_lea.hbm %s2892_s9, 32 }
  0x28   :  { %p2256_p2 = scmp.ne.s32.totalorder %s2892_s9, %s2255_s14  ;;  %p2259_p3 = scmp.lt.u32.totalorder %s2255_s14, %s2892_s9 }
  0x2a   :  { %p2261_p4 = pnand %p2259_p3, %p2256_p2 }
  0x2c   :  { %2264 = shalt.err (!%p2261_p4)
}
  0x2d   :  { %s2265_s24 = scalar_lea.vmem %s66_s21, 32  ;;  %p2270_p6 = scmp.lt.s32.totalorder %s66_s21, %s66_s21 }
  0x2e   :  { %p2266_p5 = scmp.ne.s32.totalorder %s66_s21, %s2265_s24  ;;  %p2271_p7 = scmp.lt.s32.totalorder %s2265_s24, %s2265_s24 }
  0x30   :  { %p2272_p8 = por %p2271_p7, %p2270_p6 }
  0x32   :  { %p2273_p9 = pnand %p2272_p8, %p2266_p5 }
  0x34   :  { %2276 = shalt.err (!%p2273_p9)
}
  0x35   :  { %s2310_s2 = smov 16   ;;  %s2311_s18 = smov 1  }
  0x36   :  { %71 = dma.hbm_to_vmem [thread:$0]  %s2892_s9, 32, %s66_s21, [#allocation5], %s2310_s2, %s2310_s2, %s2311_s18  }
  0x37   :  { %s2312_s27 = smov [#allocation7]   ;;  %s2277_s29 = scalar_lea.hbm %s2895_s12, 16 }
  0x38   :  { %s82_s4 = sshll.u32 %s2312_s27, 4  ;;  %p2278_p10 = scmp.ne.s32.totalorder %s2895_s12, %s2277_s29  ;;  %s83_s4 = int_to_ptr.vmem [resolvable:$true] %s82_s4 }
  0x39   :  { %p2281_p11 = scmp.lt.u32.totalorder %s2277_s29, %s2895_s12 }
  0x3b   :  { %p2283_p12 = pnand %p2281_p11, %p2278_p10 }
  0x3d   :  { %2286 = shalt.err (!%p2283_p12)
}
  0x3e   :  { %s2287_s20 = scalar_lea.vmem %s83_s4, 16  ;;  %s2291_s9 = scalar_lea.vmem %s83_s4, 32 }
  0x3f   :  { %p2288_p13 = scmp.ne.s32.totalorder %s83_s4, %s2287_s20  ;;  %p2292_p0 = scmp.lt.s32.totalorder %s83_s4, %s83_s4 }
  0x40   :  { %p2293_p1 = scmp.lt.s32.totalorder %s2291_s9, %s2287_s20 }
  0x42   :  { %p2294_p2 = por %p2293_p1, %p2292_p0 }
  0x44   :  { %p2295_p3 = pnand %p2294_p2, %p2288_p13 }
  0x46   :  { %2298 = shalt.err (!%p2295_p3)
}
  0x47   :  { %85 = dma.hbm_to_vmem [thread:$0]  %s2895_s12, 16, %s83_s4, [#allocation8]  }
  0x48   :  { %2299 = dma.done.wait [#allocation3], 16  }
  0x49   :  { %2300 = vsyncadd [#allocation3], 4294967280 }
  0x4a   :  { %2301 = dma.done.wait [#allocation5], 288  }
  0x4b   :  { %2302 = vsyncadd [#allocation5], 4294967008 }
  0x4c   :  { %2303 = dma.done.wait [#allocation8], 16  }
  0x4d   :  { %2304 = vsyncadd [#allocation8], 4294967280  ;;  %v2313_v0 = vmov 0   ;;  %v102_v1 = vld [vmem:[%s2883_s0 + $0x8] sm:$0xff]  ;;  %v101_v2 = vld [vmem:[%s2883_s0] sm:$0xff]  ;;  %v2314_v11 = vmov 1   ;;  %v103_v20 = vlaneseq }
  0x4e   :  { %2088 = vset.pattern.permute.xlu1 %v2313_v0  ;;  %2087 = vset.pattern.permute.xlu0 %v2313_v0  ;;  %v151_v3 = vld [vmem:[%s2884_s1] sm:$0xff]  ;;  %v152_v4 = vld [vmem:[%s2884_s1 + $0x8] sm:$0xff]  ;;  %v120_v5 = vadd.s32 17, %v102_v1  ;;  %v119_v6 = vadd.s32 17, %v101_v2  ;;  %v153_v8 = vld [vmem:[%s2884_s1 + $0x10] sm:$0xff]  ;;  %v135_v12 = vadd.s32 40, %v101_v2 }
  0x4f   :  { %362 = vmatprep.mubr.bf16.mxu1 %v2313_v0  ;;  %109 = vperm.xlu1 %2088, %v102_v1   ;;  %v2057_v7 = vpack.c.bf16 %v152_v4, %v151_v3  ;;  %v154_v9 = vld [vmem:[%s2884_s1 + $0x18] sm:$0xff]  ;;  %v136_v13 = vadd.s32 40, %v102_v1  ;;  %v155_v14 = vld [vmem:[%s2884_s1 + $0x20] sm:$0xff]  ;;  %v156_v15 = vld [vmem:[%s2884_s1 + $0x28] sm:$0xff]  ;;  %v2315_v17 = vmov 2   ;;  %vm165_vm0 = vcmask 1042432  }
  0x50   :  { %106 = vperm.xlu0 %2087, %v101_v2   ;;  %v2061_v10 = vpack.c.bf16 %v154_v9, %v153_v8  ;;  %v2065_v16 = vpack.c.bf16 %v156_v15, %v155_v14  ;;  %v157_v18 = vld [vmem:[%s2884_s1 + $0x30] sm:$0x7]  ;;  %v2316_v19 = vmov 0.0   ;;  %v104_v23 = vand.u32 127, %v103_v20  ;;  %v1798_v53 = vld [vmem:[#allocation2] ss:$0 sm:$0xff] }
  0x51   :  { %2058 = vmatprep.subr.bf16.mxu0 %v2057_v7  ;;  %vm158_vm7 = vcmask 416768   ;;  %vm248_vm8 = vcmask 261120   ;;  %v2093_v63 = vld [vmem:[%s2890_s7 + $0x4] ss:$8 sps:$4 sm:$0xff]   ;;  %v2095_v1 = vld [vmem:[%s2890_s7] ss:$8 sps:$4 sm:$0xff]  }
  0x52   :  { %2060 = vmatpush3.bf16.msra.mxu0 %v2057_v7  ;;  %v2096_v2 = vld [vmem:[%s2890_s7 + $0x14] ss:$8 sps:$4 sm:$0xff]   ;;  %330 = vmatprep.subr.bf16.mxu1 %v2093_v63  ;;  %v2098_v3 = vld [vmem:[%s2890_s7 + $0x10] ss:$8 sps:$4 sm:$0xff]   ;;  %v273_v4 = vld [vmem:[%s2886_s3] sm:$0xff]  ;;  %s2317_s28 = smov 96  }
  0x53   :  { %2090 = vset.pattern.permute.xlu1 %v2314_v11  ;;  %2062 = vmatprep.subr.bf16.mxu0 %v2061_v10  ;;  %s2318_s29 = smov 32   ;;  %s2319_s30 = smov 64   ;;  %v2529_v7 = vld [vmem:[#allocation4 + $0x8] sm:$0xff]  ;;  %v1799_v15 = vld [vmem:[%s2889_s6] ss:$0 sm:$0xff]  ;;  %vm2320_vm9 = vmmov 0  }
  0x54   :  { %2089 = vset.pattern.permute.xlu0 %v2314_v11  ;;  %125 = vperm.xlu1 %2090, %v120_v5   ;;  %v274_v5 = vld [vmem:[%s2886_s3 + $0x8] sm:$0xff]  ;;  %s2321_s16 = smov 48   ;;  %s2322_s14 = smov 112   ;;  %vm429_vm10 = vcmask 130048   ;;  %vm936_vm11 = vcmask 523264   ;;  %vm1773_vm12 = vcmask 785408  }
  0x55   :  { %122 = vperm.xlu0 %2089, %v119_v6   ;;  %331 = vmatpush1.bf16.msra.mxu1 %v2095_v1  ;;  %v2523_v6 = vld [vmem:[#allocation4] sm:$0xff]  ;;  %s2901_s26 = sld [smem:[#allocation12_spill]] }
  0x56   :  { %2064 = vmatpush3.bf16.msra.mxu0 %v2061_v10  ;;  %332 = vmatprep.subr.bf16.mxu1 %v2096_v2 }
  0x57   :  { %2066 = vmatprep.subr.bf16.mxu0 %v2065_v16 }
  0x58   :  { %2091 = vset.pattern.permute.xlu1 %v2315_v17 }
  0x59   :  { %2092 = vset.pattern.permute.xlu0 %v2315_v17  ;;  %138 = vperm.xlu1 %2091, %v135_v12  }
  0x5a   :  { %141 = vperm.xlu0 %2092, %v136_v13   ;;  %2068 = vmatpush3.bf16.msra.mxu0 %v2065_v16 }
  0x5b   :  { %1940 = vmatprep.subr.msk.mxu0 %vm165_vm0, %v157_v18  ;;  %333 = vmatpush1.bf16.msra.mxu1 %v2098_v3 }
  0x5c   :  { %1945 = vmatprep.subr.bf16.mxu1 %v2316_v19 }
  0x5e   :  { %1941 = vmatpush3.msk.msra.mxu0 %vm165_vm0, %v157_v18 }
  0x5f   :  { %1951 = vmatprep.subr.bf16.mxu0 %v2316_v19 }
  0xce   :  { %v110_v21 = vpop.permute.xlu1 %109 }
  0xcf   :  { %v107_v22 = vpop.permute.xlu0 %106  ;;  %vm112_vm3 = vcmp.eq.s32.totalorder %v104_v23, %v110_v21 }
  0xd0   :  { %vm111_vm4 = vcmp.eq.s32.totalorder %v104_v23, %v107_v22  ;;  %v1790_v28 = vsel %vm112_vm3, 1.0, %v2316_v19 }
  0xd1   :  { %v1789_v29 = vsel %vm111_vm4, 1.0, %v2316_v19 }
  0xd3   :  { %v126_v24 = vpop.permute.xlu1 %125 }
  0xd4   :  { %v123_v25 = vpop.permute.xlu0 %122  ;;  %vm128_vm1 = vcmp.eq.s32.totalorder %v104_v23, %v126_v24 }
  0xd5   :  { %vm127_vm2 = vcmp.eq.s32.totalorder %v104_v23, %v123_v25  ;;  %v1792_v26 = vsel %vm128_vm1, 1.0, %v2316_v19 }
  0xd6   :  { %v1791_v27 = vsel %vm127_vm2, 1.0, %v2316_v19  ;;  %v134_v32 = vadd.f32 %v1792_v26, %v1790_v28 }
  0xd7   :  { %v133_v33 = vadd.f32 %v1791_v27, %v1789_v29 }
  0xd8   :  { %v139_v30 = vpop.permute.xlu1 %138 }
  0xd9   :  { %v142_v31 = vpop.permute.xlu0 %141  ;;  %vm143_vm5 = vcmp.eq.s32.totalorder %v104_v23, %v139_v30 }
  0xda   :  { %vm144_vm6 = vcmp.eq.s32.totalorder %v104_v23, %v142_v31  ;;  %v1793_v34 = vsel %vm143_vm5, 1.0, %v2316_v19 }
  0xdb   :  { %v1794_v35 = vsel %vm144_vm6, 1.0, %v2316_v19  ;;  %v149_v37 = vadd.f32 %v1793_v34, %v133_v33 }
  0xdc   :  { %v150_v36 = vadd.f32 %v1794_v35, %v134_v32 }
  0xdd   :  { %1942 = vmatprep.mubr.msk.f32.mxu0 %vm158_vm7, %v149_v37 }
  0xde   :  { %1943 = vmatmul.mubr.msk.f32.vlgmr.msra.gmra.mrb[0].mxu0 %vm158_vm7, %v150_v36 }
  0xdf   :  { %1953 = vmatprep.mubr.msk.bf16.mxu0 %vm2320_vm9, %v2316_v19 }
 0x1b1   :  { %v1944_v38 = vpop.f32.mrb[0].mxu0 }
 0x1b2   :  { %v245_v39 = vmul.f32 5.656854, %v1944_v38  ;;  %v235_v40 = vpop.f32.mrb[1].mxu0 }
 0x1b3   :  { %v244_v41 = vmul.f32 5.656854, %v235_v40 }
 0x1b4   :  { %v247_v42 = vmul.f32 %v245_v39, %v245_v39 }
 0x1b5   :  { %v246_v43 = vmul.f32 %v244_v41, %v244_v41 }
 0x1b6   :  { %v252_v44 = vsel %vm248_vm8, %v247_v42, 0.0 }
 0x1b7   :  { %253 = vadd.xlane.f32.xlu0 %v252_v44  ;;  %v249_v45 = vsel %vm248_vm8, %v246_v43, 0.0 }
 0x1b8   :  { %250 = vadd.xlane.f32.xlu1 %v249_v45 }
 0x244   :  { %v254_v46 = vpop.xlane.xlu0 %253 }
 0x245   :  { %v257_v47 = vmul.f32 0.03125, %v254_v46  ;;  %v251_v48 = vpop.xlane.xlu1 %250 }
 0x246   :  { %v256_v49 = vmul.f32 0.03125, %v251_v48 }
 0x247   :  { %v259_v50 = vadd.f32 1e-05, %v257_v47 }
 0x248   :  { %v258_v51 = vadd.f32 1e-05, %v256_v49 }
 0x249   :  { %2123 = vrsqrt.f32 %v259_v50 }
 0x24a   :  { %2125 = vrsqrt.f32 %v258_v51 }
 0x253   :  { %v2124_v52 = vpop.eup %2123 }
 0x254   :  { %v2126_v54 = vpop.eup %2125  ;;  %v263_v55 = vmul.f32 %v2124_v52, %v245_v39 }
 0x255   :  { %v262_v56 = vmul.f32 %v2126_v54, %v244_v41 }
 0x256   :  { %v2492_v57 = vmul.f32 %v1798_v53, %v263_v55 }
 0x257   :  { %v2494_v58 = vmul.f32 %v1798_v53, %v262_v56 }
 0x258   :  { %v278_v59 = vmul.f32 %v2492_v57, %v2492_v57 }
 0x259   :  { %v277_v60 = vmul.f32 %v2494_v58, %v2494_v58 }
 0x25a   :  { %v282_v61 = vsel %vm248_vm8, %v278_v59, 0.0  ;;  %v2593_v59 = vld [vmem:[%s2888_s5] sm:$0xff] }
 0x25b   :  { %283 = vadd.xlane.f32.xlu0 %v282_v61  ;;  %v279_v62 = vsel %vm248_vm8, %v277_v60, 0.0  ;;  %v2598_v61 = vld [vmem:[%s2888_s5 + $0x8] sm:$0xff] }
 0x25c   :  { %280 = vadd.xlane.f32.xlu1 %v279_v62 }
 0x26d   :  { %405 = vrot.lane.b32.xlu1 %v273_v4, %s2317_s28 }
 0x271   :  { %407 = vrot.lane.b32.xlu0 %v274_v5, %s2317_s28  ;;  %377 = vrot.lane.b32.xlu1 %v273_v4, %s2318_s29 }
 0x275   :  { %397 = vrot.lane.b32.xlu0 %v2523_v6, %s2319_s30  ;;  %379 = vrot.lane.b32.xlu1 %v274_v5, %s2318_s29 }
 0x279   :  { %399 = vrot.lane.b32.xlu1 %v2529_v7, %s2319_s30 }
 0x2e8   :  { %v284_v8 = vpop.xlane.xlu0 %283 }
 0x2e9   :  { %v286_v9 = vmul.f32 0.03125, %v284_v8  ;;  %v281_v10 = vpop.xlane.xlu1 %280 }
 0x2ea   :  { %v285_v11 = vmul.f32 0.03125, %v281_v10 }
 0x2eb   :  { %v288_v12 = vadd.f32 1e-05, %v286_v9  ;;  %v2606_v9 = vld [vmem:[%s2888_s5 + $0x10] sm:$0xff] }
 0x2ec   :  { %v287_v13 = vadd.f32 1e-05, %v285_v11  ;;  %v2546_v28 = vpop.permute.xlu0 %407 }
 0x2ed   :  { %2127 = vrsqrt.f32 %v288_v12  ;;  %v2539_v23 = vpop.permute.xlu1 %405  ;;  %v2612_v12 = vld [vmem:[%s2888_s5 + $0x18] sm:$0xff] }
 0x2ee   :  { %2129 = vrsqrt.f32 %v287_v13 }
 0x2f0   :  { %v2565_v36 = vpop.permute.xlu0 %397 }
 0x2f1   :  { %v2541_v24 = vpop.permute.xlu1 %377 }
 0x2f5   :  { %v2558_v34 = vpop.permute.xlu1 %379 }
 0x2f7   :  { %v2128_v14 = vpop.eup %2127 }
 0x2f8   :  { %v2130_v16 = vpop.eup %2129  ;;  %v292_v17 = vmul.f32 %v2128_v14, %v2492_v57 }
 0x2f9   :  { %v291_v18 = vmul.f32 %v2130_v16, %v2494_v58  ;;  %v2567_v37 = vpop.permute.xlu1 %399 }
 0x2fa   :  { %v301_v20 = vmul.f32 %v1799_v15, %v292_v17 }
 0x2fb   :  { %v300_v21 = vmul.f32 %v1799_v15, %v291_v18 }
 0x2fd   :  { %v306_v22 = vpack.c.bf16 %v301_v20, %v300_v21 }
 0x2ff   :  { %1804 = vmatmul.mubr.msk.bf16.vlgmr.msra.gmra.mrb[0].mxu1 %vm248_vm8, %v306_v22 }
 0x300   :  { %1947 = vmatprep.mubr.msk.bf16.mxu1 %vm2320_vm9, %v2316_v19 }
 0x3d2   :  { %v364_v25 = vpop.f32.mrb[0].mxu1 }
 0x3d3   :  { %v2543_v26 = vpop.f32.mrb[1].mxu1  ;;  %v411_v27 = vmul.f32 %v2539_v23, %v364_v25  ;;  %v383_v33 = vmul.f32 %v2541_v24, %v364_v25  ;;  %v403_v40 = vmul.f32 %v2565_v36, %v364_v25  ;;  %v373_v46 = vmul.f32 %v364_v25, %v2523_v6 }
 0x3d4   :  { %v368_v29 = vpop.f32.mrb[2].mxu1 }
 0x3d5   :  { %v2548_v30 = vpop.f32.mrb[3].mxu1  ;;  %415 = vrot.lane.b32.xlu0 %v411_v27, %s2317_s28  ;;  %v412_v31 = vmul.f32 %v2546_v28, %v368_v29  ;;  %v384_v35 = vmul.f32 %v2558_v34, %v368_v29  ;;  %v404_v39 = vmul.f32 %v2567_v37, %v368_v29  ;;  %v374_v47 = vmul.f32 %v368_v29, %v2529_v7 }
 0x3d6   :  { %v2554_v32 = vpack.c.bf16 %v2548_v30, %v2543_v26 }
 0x3d7   :  { %417 = vrot.lane.b32.xlu1 %v412_v31, %s2317_s28 }
 0x3d8   :  { %1952 = vmatpush3.bf16.msra.mxu0 %v2554_v32 }
 0x3d9   :  { %387 = vrot.lane.b32.xlu0 %v383_v33, %s2317_s28  ;;  %1963 = vmatprep.subr.bf16.mxu0 %v2316_v19 }
 0x3db   :  { %389 = vrot.lane.b32.xlu1 %v384_v35, %s2317_s28 }
 0x447   :  { %v416_v38 = vpop.permute.xlu0 %415 }
 0x448   :  { %v421_v42 = vadd.f32 %v416_v38, %v403_v40 }
 0x449   :  { %v418_v41 = vpop.permute.xlu1 %417 }
 0x44a   :  { %v422_v43 = vadd.f32 %v418_v41, %v404_v39 }
 0x44b   :  { %v388_v44 = vpop.permute.xlu0 %387 }
 0x44c   :  { %v424_v45 = vpack.c.bf16 %v422_v43, %v421_v42  ;;  %v393_v49 = vadd.f32 %v388_v44, %v373_v46 }
 0x44d   :  { %v390_v48 = vpop.permute.xlu1 %389 }
 0x44e   :  { %v394_v50 = vadd.f32 %v390_v48, %v374_v47  ;;  %560 = vrot.lane.b32.xlu1 %v424_v45, %s2321_s16  ;;  %427 = vrot.lane.b32.xlu0 %v424_v45, %s2319_s30 }
 0x450   :  { %v423_v51 = vpack.c.bf16 %v394_v50, %v393_v49 }
 0x452   :  { %558 = vrot.lane.b32.xlu0 %v423_v51, %s2322_s14 }
 0x4c0   :  { %v428_v52 = vpop.permute.xlu0 %427  ;;  %v561_v54 = vpop.permute.xlu1 %560 }
 0x4c1   :  { %v434_v53 = vsel %vm429_vm10, %v428_v52, 0  ;;  %v566_v55 = vsel %vm429_vm10, %v561_v54, 0 }
 0x4c2   :  { %1946 = vmatpush3.bf16.xpose.msra.mxu1 %v434_v53 }
 0x4c3   :  { %1957 = vmatprep.subr.bf16.mxu1 %v2316_v19 }
 0x4c4   :  { %v559_v56 = vpop.permute.xlu0 %558 }
 0x4c9   :  { %1948 = vmatmul.mubr.msk.bf16.vlgmr.msra.gmra.mrb[4].mxu1 %vm429_vm10, %v423_v51 }
 0x4ca   :  { %1958 = vmatpush3.bf16.xpose.msra.mxu1 %v566_v55  ;;  %1959 = vmatprep.mubr.msk.bf16.mxu1 %vm2320_vm9, %v2316_v19 }
 0x4cb   :  { %1969 = vmatprep.subr.bf16.mxu1 %v2316_v19 }
 0x4d1   :  { %1960 = vmatmul.mubr.msk.bf16.vlgmr.msra.gmra.mrb[8].mxu1 %vm429_vm10, %v559_v56 }
 0x4d2   :  { %1973 = vmatprep.mubr.msk.bf16.mxu1 %vm2320_vm9, %v2316_v19 }
 0x59c   :  { %v470_v60 = vpop.f32.mrb[4].mxu1 }
 0x59d   :  { %v479_v62 = vmul.f32 %v2593_v59, %v470_v60  ;;  %v1949_v63 = vpop.f32.mrb[5].mxu1 }
 0x59e   :  { %v473_v1 = vpop.f32.mrb[6].mxu1 }
 0x59f   :  { %v480_v2 = vmul.f32 %v2598_v61, %v473_v1  ;;  %v1950_v3 = vpop.f32.mrb[7].mxu1  ;;  %v481_v4 = vand.u32 2147483647, %v479_v62 }
 0x5a1   :  { %v483_v5 = vsel %vm429_vm10, %v481_v4, 0.0  ;;  %v482_v8 = vand.u32 2147483647, %v480_v2 }
 0x5a2   :  { %484 = vadd.xlane.f32.xlu1 %v483_v5 }
 0x5a3   :  { %v486_v10 = vsel %vm429_vm10, %v482_v8, 0.0 }
 0x5a4   :  { %487 = vadd.xlane.f32.xlu0 %v486_v10  ;;  %v602_v11 = vpop.f32.mrb[8].mxu1 }
 0x5a5   :  { %v612_v13 = vmul.f32 %v2606_v9, %v602_v11  ;;  %v1961_v14 = vpop.f32.mrb[9].mxu1 }
 0x5a6   :  { %v605_v15 = vpop.f32.mrb[10].mxu1 }
 0x5a7   :  { %v613_v16 = vmul.f32 %v2612_v12, %v605_v15  ;;  %v1962_v17 = vpop.f32.mrb[11].mxu1  ;;  %v614_v18 = vand.u32 2147483647, %v612_v13 }
 0x5a9   :  { %v616_v20 = vsel %vm429_vm10, %v614_v18, 0.0  ;;  %v615_v21 = vand.u32 2147483647, %v613_v16 }
 0x5aa   :  { %617 = vadd.xlane.f32.xlu0 %v616_v20 }
 0x5ab   :  { %v619_v22 = vsel %vm429_vm10, %v615_v21, 0.0 }
 0x5ac   :  { %620 = vadd.xlane.f32.xlu1 %v619_v22 }
 0x5c0   :  { %630 = vrot.lane.b32.xlu0 %v2554_v32, %s2322_s14 }
 0x62f   :  { %v485_v25 = vpop.xlane.xlu1 %484 }
 0x630   :  { %v489_v27 = vmax.f32 %v485_v25, 1.0 }
 0x631   :  { %v488_v29 = vpop.xlane.xlu0 %487 }
 0x632   :  { %2131 = vrcp.f32 %v489_v27  ;;  %v490_v31 = vmax.f32 %v488_v29, 1.0 }
 0x634   :  { %2133 = vrcp.f32 %v490_v31 }
 0x637   :  { %v618_v33 = vpop.xlane.xlu0 %617 }
 0x638   :  { %v622_v35 = vmax.f32 %v618_v33, 1.0 }
 0x639   :  { %v621_v38 = vpop.xlane.xlu1 %620 }
 0x63a   :  { %2135 = vrcp.f32 %v622_v35  ;;  %v623_v39 = vmax.f32 %v621_v38, 1.0  ;;  %v2099_v38 = vld [vmem:[%s2891_s8] sm:$0xff]  }
 0x63b   :  { %v631_v45 = vpop.permute.xlu0 %630  ;;  %1970 = vmatpush3.bf16.msra.mxu1 %v2099_v38 }
 0x63c   :  { %v2132_v40 = vpop.eup %2131  ;;  %2137 = vrcp.f32 %v623_v39  ;;  %1971 = vmatprep.subr.bf16.mxu1 %v2316_v19 }
 0x63d   :  { %v492_v42 = vmul.f32 %v2132_v40, %v479_v62  ;;  %v2100_v40 = vld [vmem:[%s2891_s8 + $0x8] sm:$0xff]  }
 0x63e   :  { %v2134_v41 = vpop.eup %2133 }
 0x63f   :  { %v494_v43 = vmul.f32 %v2134_v41, %v480_v2  ;;  %1972 = vmatpush3.bf16.msra.mxu1 %v2100_v40 }
 0x640   :  { %1985 = vmatprep.subr.bf16.mxu1 %v2316_v19 }
 0x641   :  { %v495_v44 = vpack.c.bf16 %v494_v43, %v492_v42 }
 0x643   :  { %1954 = vmatmul.mubr.msk.bf16.vlgmr.msra.gmra.mrb[4].mxu0 %vm429_vm10, %v495_v44 }
 0x644   :  { %v2136_v32 = vpop.eup %2135  ;;  %1964 = vmatpush3.bf16.msra.mxu0 %v631_v45  ;;  %1965 = vmatprep.mubr.msk.bf16.mxu0 %vm2320_vm9, %v2316_v19 }
 0x645   :  { %1977 = vmatprep.subr.bf16.mxu0 %v2316_v19  ;;  %v625_v47 = vmul.f32 %v2136_v32, %v612_v13 }
 0x646   :  { %v2138_v46 = vpop.eup %2137 }
 0x647   :  { %v627_v48 = vmul.f32 %v2138_v46, %v613_v16  ;;  %v1811_v46 = vmul.f32 -1.442695, %v2543_v26 }
 0x649   :  { %v628_v49 = vpack.c.bf16 %v627_v48, %v625_v47  ;;  %v1812_v47 = vmul.f32 -1.442695, %v2548_v30 }
 0x64b   :  { %1966 = vmatmul.mubr.msk.bf16.vlgmr.msra.gmra.mrb[8].mxu0 %vm429_vm10, %v628_v49 }
 0x64c   :  { %1981 = vmatprep.mubr.msk.bf16.mxu0 %vm2320_vm9, %v2316_v19 }
 0x716   :  { %v533_v50 = vpop.f32.mrb[4].mxu0 }
 0x717   :  { %v1955_v51 = vpop.f32.mrb[5].mxu0  ;;  %v540_v2 = vmul.f32 %v533_v50, %v533_v50 }
 0x718   :  { %v536_v52 = vpop.f32.mrb[6].mxu0 }
 0x719   :  { %v1956_v53 = vpop.f32.mrb[7].mxu0  ;;  %v541_v4 = vmul.f32 %v536_v52, %v536_v52  ;;  %v542_v5 = vsel %vm429_vm10, %v540_v2, 0.0 }
 0x71b   :  { %v545_v8 = vsel %vm429_vm10, %v541_v4, 0.0 }
 0x71e   :  { %v670_v54 = vpop.f32.mrb[8].mxu0 }
 0x71f   :  { %v677_v55 = vmul.f32 %v670_v54, %v670_v54  ;;  %v1967_v56 = vpop.f32.mrb[9].mxu0 }
 0x720   :  { %v673_v60 = vpop.f32.mrb[10].mxu0 }
 0x721   :  { %v678_v62 = vmul.f32 %v673_v60, %v673_v60  ;;  %v1968_v63 = vpop.f32.mrb[11].mxu0  ;;  %v679_v1 = vsel %vm429_vm10, %v677_v55, 0.0 }
 0x722   :  { %680 = vadd.xlane.f32.xlu1 %v679_v1 }
 0x723   :  { %v682_v3 = vsel %vm429_vm10, %v678_v62, 0.0 }
 0x726   :  { %683 = vadd.xlane.f32.xlu1 %v682_v3 }
 0x72a   :  { %543 = vadd.xlane.f32.xlu1 %v542_v5 }
 0x72e   :  { %546 = vadd.xlane.f32.xlu1 %v545_v8 }
 0x7af   :  { %v681_v10 = vpop.xlane.xlu1 %680 }
 0x7b0   :  { %v685_v11 = vmul.f32 0.0625, %v681_v10 }
 0x7b2   :  { %v687_v13 = vadd.f32 1e-05, %v685_v11 }
 0x7b3   :  { %v684_v14 = vpop.xlane.xlu1 %683 }
 0x7b4   :  { %2139 = vrsqrt.f32 %v687_v13  ;;  %v686_v15 = vmul.f32 0.0625, %v684_v14 }
 0x7b6   :  { %v688_v16 = vadd.f32 1e-05, %v686_v15  ;;  %v2101_v15 = vld [vmem:[%s2893_s10] sm:$0xff]  }
 0x7b7   :  { %v544_v22 = vpop.xlane.xlu1 %543  ;;  %1978 = vmatpush3.bf16.msra.mxu0 %v2101_v15 }
 0x7b8   :  { %2141 = vrsqrt.f32 %v688_v16  ;;  %v549_v25 = vmul.f32 0.0625, %v544_v22  ;;  %v2102_v16 = vld [vmem:[%s2893_s10 + $0x8] sm:$0xff]   ;;  %1979 = vmatprep.subr.bf16.mxu0 %v2316_v19 }
 0x7ba   :  { %v551_v29 = vadd.f32 1e-05, %v549_v25 }
 0x7bb   :  { %v547_v27 = vpop.xlane.xlu1 %546  ;;  %1980 = vmatpush3.bf16.msra.mxu0 %v2102_v16 }
 0x7bc   :  { %v550_v31 = vmul.f32 0.0625, %v547_v27  ;;  %2143 = vrsqrt.f32 %v551_v29 }
 0x7be   :  { %v2140_v17 = vpop.eup %2139  ;;  %v552_v33 = vadd.f32 1e-05, %v550_v31 }
 0x7bf   :  { %v691_v18 = vmul.f32 %v2140_v17, %v670_v54 }
 0x7c0   :  { %2145 = vrsqrt.f32 %v552_v33  ;;  %v1816_v33 = vld [vmem:[#allocation6] ss:$0 sm:$0xff] }
 0x7c1   :  { %695 = vrot.lane.b32.xlu1 %v691_v18, %s2310_s2  ;;  %2147 = vpow2.f32 %v1811_v46 }
 0x7c2   :  { %v2142_v20 = vpop.eup %2141  ;;  %2149 = vpow2.f32 %v1812_v47 }
 0x7c3   :  { %v692_v21 = vmul.f32 %v2142_v20, %v673_v60 }
 0x7c5   :  { %697 = vrot.lane.b32.xlu0 %v692_v21, %s2310_s2 }
 0x7c6   :  { %v2144_v35 = vpop.eup %2143 }
 0x7c7   :  { %v555_v39 = vmul.f32 %v2144_v35, %v533_v50 }
 0x7ca   :  { %v2146_v41 = vpop.eup %2145 }
 0x7cb   :  { %v556_v44 = vmul.f32 %v2146_v41, %v536_v52  ;;  %v2148_v48 = vpop.eup %2147  ;;  %v2103_v41 = vld [vmem:[%s2894_s11] sm:$0xff]  }
 0x7cc   :  { %v2150_v49 = vpop.eup %2149  ;;  %v709_v50 = vadd.f32 1.0, %v2148_v48 }
 0x7cd   :  { %v710_v51 = vadd.f32 1.0, %v2150_v49 }
 0x7ce   :  { %2151 = vrcp.f32 %v709_v50 }
 0x7cf   :  { %2153 = vrcp.f32 %v710_v51 }
 0x7d8   :  { %v2152_v52 = vpop.eup %2151 }
 0x7d9   :  { %v2154_v53 = vpop.eup %2153  ;;  %v715_v55 = vmul.f32 %v2152_v52, %v2543_v26 }
 0x7da   :  { %v716_v56 = vmul.f32 %v2154_v53, %v2548_v30 }
 0x833   :  { %v696_v42 = vpop.permute.xlu1 %695 }
 0x834   :  { %v701_v43 = vsel %vm429_vm10, %v555_v39, %v696_v42  ;;  %v2104_v42 = vld [vmem:[%s2894_s11 + $0x8] sm:$0xff]  }
 0x835   :  { %719 = vrot.lane.b32.xlu0 %v701_v43, %s2318_s29  ;;  %v2105_v43 = vld [vmem:[%s2894_s11 + $0x10] sm:$0xff]  }
 0x837   :  { %v698_v45 = vpop.permute.xlu0 %697 }
 0x838   :  { %v702_v32 = vsel %vm429_vm10, %v556_v44, %v698_v45 }
 0x839   :  { %721 = vrot.lane.b32.xlu0 %v702_v32, %s2318_s29 }
 0x8a7   :  { %v720_v54 = vpop.permute.xlu0 %719 }
 0x8a8   :  { %v725_v62 = vmul.f32 %v720_v54, %v715_v55 }
 0x8ab   :  { %v722_v60 = vpop.permute.xlu0 %721 }
 0x8ac   :  { %v726_v63 = vmul.f32 %v722_v60, %v716_v56 }
 0x8ae   :  { %v731_v1 = vpack.c.bf16 %v726_v63, %v725_v62 }
 0x8b0   :  { %733 = vrot.lane.b32.xlu0 %v731_v1, %s2317_s28 }
 0x922   :  { %v734_v2 = vpop.permute.xlu0 %733 }
 0x923   :  { %1974 = vmatmul.mubr.msk.bf16.vlgmr.msra.gmra.mrb[12].mxu1 %vm248_vm8, %v734_v2 }
 0x924   :  { %1993 = vmatprep.mubr.msk.bf16.mxu1 %vm2320_vm9, %v2316_v19  ;;  %1986 = vmatpush3.bf16.msra.mxu1 %v2103_v41 }
 0x925   :  { %1987 = vmatprep.subr.bf16.mxu1 %v2316_v19 }
 0x928   :  { %1988 = vmatpush3.bf16.msra.mxu1 %v2104_v42 }
 0x929   :  { %1989 = vmatprep.subr.bf16.mxu1 %v2316_v19 }
 0x92c   :  { %1990 = vmatpush3.bf16.msra.mxu1 %v2105_v43 }
 0x92d   :  { %1991 = vmatprep.subr.bf16.mxu1 %v2316_v19 }
 0x9f6   :  { %v784_v3 = vpop.f32.mrb[12].mxu1 }
 0x9f7   :  { %v2654_v4 = vadd.f32 %v784_v3, %v2494_v58  ;;  %v1975_v5 = vpop.f32.mrb[13].mxu1 }
 0x9f8   :  { %v787_v26 = vpop.f32.mrb[14].mxu1 }
 0x9f9   :  { %v2657_v30 = vadd.f32 %v787_v26, %v2492_v57  ;;  %v1976_v8 = vpop.f32.mrb[15].mxu1  ;;  %v793_v10 = vmul.f32 %v2654_v4, %v2654_v4 }
 0x9fb   :  { %v795_v11 = vsel %vm248_vm8, %v793_v10, 0.0  ;;  %v794_v13 = vmul.f32 %v2657_v30, %v2657_v30 }
 0x9fc   :  { %796 = vadd.xlane.f32.xlu1 %v795_v11 }
 0x9fd   :  { %v798_v14 = vsel %vm248_vm8, %v794_v13, 0.0 }
 0x9fe   :  { %799 = vadd.xlane.f32.xlu0 %v798_v14 }
 0xa89   :  { %v797_v17 = vpop.xlane.xlu1 %796 }
 0xa8a   :  { %v801_v18 = vmul.f32 0.03125, %v797_v17  ;;  %v2110_v17 = vld [vmem:[%s2890_s7 + $0x30] ss:$8 sps:$4 sm:$0xff]  }
 0xa8b   :  { %v800_v20 = vpop.xlane.xlu0 %799 }
 0xa8c   :  { %v803_v21 = vadd.f32 1e-05, %v801_v18  ;;  %v802_v22 = vmul.f32 0.03125, %v800_v20  ;;  %v2112_v18 = vld [vmem:[%s2890_s7 + $0x34] ss:$8 sps:$4 sm:$0xff]  }
 0xa8e   :  { %2155 = vrsqrt.f32 %v803_v21  ;;  %v804_v25 = vadd.f32 1e-05, %v802_v22 }
 0xa90   :  { %2157 = vrsqrt.f32 %v804_v25 }
 0xa98   :  { %v2156_v27 = vpop.eup %2155 }
 0xa99   :  { %v807_v29 = vmul.f32 %v2156_v27, %v2654_v4 }
 0xa9a   :  { %v2158_v31 = vpop.eup %2157 }
 0xa9b   :  { %v808_v35 = vmul.f32 %v2158_v31, %v2657_v30  ;;  %v816_v38 = vmul.f32 %v1816_v33, %v807_v29 }
 0xa9d   :  { %v817_v39 = vmul.f32 %v1816_v33, %v808_v35 }
 0xa9f   :  { %v822_v40 = vpack.c.bf16 %v817_v39, %v816_v38  ;;  %v1828_v38 = vld [vmem:[%s2889_s6 + $0x1] ss:$0 sm:$0xff] }
 0xaa1   :  { %1982 = vmatmul.mubr.msk.bf16.vlgmr.msra.gmra.mrb[12].mxu0 %vm248_vm8, %v822_v40 }
 0xaa2   :  { %1070 = vmatprep.mubr.bf16.mxu0 %v2313_v0  ;;  %v2106_v0 = vld [vmem:[%s2894_s11 + $0x18] sm:$0xff]  }
 0xaa3   :  { %1992 = vmatpush3.bf16.msra.mxu1 %v2106_v0 }
 0xaa4   :  { %2003 = vmatprep.subr.bf16.mxu1 %v2316_v19 }
 0xb74   :  { %v872_v44 = vpop.f32.mrb[12].mxu0 }
 0xb75   :  { %895 = vrot.lane.b32.xlu0 %v872_v44, %s2319_s30  ;;  %v1983_v45 = vpop.f32.mrb[13].mxu0  ;;  %v1820_v47 = vmul.f32 -1.442695, %v872_v44 }
 0xb76   :  { %v875_v32 = vpop.f32.mrb[14].mxu0 }
 0xb77   :  { %897 = vrot.lane.b32.xlu1 %v875_v32, %s2319_s30  ;;  %v1984_v46 = vpop.f32.mrb[15].mxu0  ;;  %v1821_v48 = vmul.f32 -1.442695, %v875_v32  ;;  %2159 = vpow2.f32 %v1820_v47 }
 0xb79   :  { %2161 = vpow2.f32 %v1821_v48 }
 0xb81   :  { %v2160_v49 = vpop.eup %2159 }
 0xb82   :  { %v885_v51 = vadd.f32 1.0, %v2160_v49 }
 0xb83   :  { %v2162_v50 = vpop.eup %2161 }
 0xb84   :  { %v886_v52 = vadd.f32 1.0, %v2162_v50  ;;  %2163 = vrcp.f32 %v885_v51 }
 0xb86   :  { %2165 = vrcp.f32 %v886_v52 }
 0xb8e   :  { %v2164_v53 = vpop.eup %2163 }
 0xb8f   :  { %v891_v56 = vmul.f32 %v2164_v53, %v872_v44 }
 0xb90   :  { %v2166_v54 = vpop.eup %2165 }
 0xb91   :  { %v892_v60 = vmul.f32 %v2166_v54, %v875_v32 }
 0xbe7   :  { %v896_v55 = vpop.permute.xlu0 %895 }
 0xbe8   :  { %v901_v63 = vmul.f32 %v896_v55, %v891_v56 }
 0xbe9   :  { %v898_v62 = vpop.permute.xlu1 %897 }
 0xbea   :  { %v902_v1 = vmul.f32 %v898_v62, %v892_v60 }
 0xbec   :  { %v911_v2 = vpack.c.bf16 %v902_v1, %v901_v63 }
 0xbee   :  { %1994 = vmatmul.mubr.msk.bf16.vlgmr.msra.gmra.mrb[16].mxu1 %vm936_vm11, %v911_v2 }
 0xbef   :  { %2005 = vmatprep.mubr.msk.bf16.mxu1 %vm2320_vm9, %v2316_v19 }
 0xcc1   :  { %v974_v3 = vpop.f32.mrb[16].mxu1 }
 0xcc2   :  { %v2698_v5 = vadd.f32 %v974_v3, %v2654_v4  ;;  %v1995_v26 = vpop.f32.mrb[17].mxu1  ;;  %v2109_v4 = vld [vmem:[%s2890_s7 + $0x24] ss:$8 sps:$4 sm:$0xff]  }
 0xcc3   :  { %v977_v8 = vpop.f32.mrb[18].mxu1  ;;  %1038 = vmatprep.subr.bf16.mxu0 %v2109_v4 }
 0xcc4   :  { %v2701_v10 = vadd.f32 %v977_v8, %v2657_v30  ;;  %v1996_v11 = vpop.f32.mrb[19].mxu1  ;;  %v983_v13 = vmul.f32 %v2698_v5, %v2698_v5  ;;  %v2107_v30 = vld [vmem:[%s2890_s7 + $0x20] ss:$8 sps:$4 sm:$0xff]  }
 0xcc5   :  { %1039 = vmatpush1.bf16.msra.mxu0 %v2107_v30 }
 0xcc6   :  { %v985_v14 = vsel %vm248_vm8, %v983_v13, 0.0  ;;  %v984_v15 = vmul.f32 %v2701_v10, %v2701_v10  ;;  %1040 = vmatprep.subr.bf16.mxu0 %v2112_v18 }
 0xcc7   :  { %986 = vadd.xlane.f32.xlu1 %v985_v14 }
 0xcc8   :  { %v988_v16 = vsel %vm248_vm8, %v984_v15, 0.0 }
 0xcc9   :  { %989 = vadd.xlane.f32.xlu0 %v988_v16  ;;  %1041 = vmatpush1.bf16.msra.mxu0 %v2110_v17 }
 0xcca   :  { %1997 = vmatprep.subr.bf16.mxu0 %v2316_v19 }
 0xd54   :  { %v987_v20 = vpop.xlane.xlu1 %986 }
 0xd55   :  { %v991_v21 = vmul.f32 0.03125, %v987_v20 }
 0xd56   :  { %v990_v22 = vpop.xlane.xlu0 %989 }
 0xd57   :  { %v993_v25 = vadd.f32 1e-05, %v991_v21  ;;  %v992_v27 = vmul.f32 0.03125, %v990_v22 }
 0xd59   :  { %2167 = vrsqrt.f32 %v993_v25  ;;  %v994_v29 = vadd.f32 1e-05, %v992_v27 }
 0xd5b   :  { %2169 = vrsqrt.f32 %v994_v29 }
 0xd63   :  { %v2168_v31 = vpop.eup %2167 }
 0xd64   :  { %v997_v33 = vmul.f32 %v2168_v31, %v2698_v5 }
 0xd65   :  { %v2170_v35 = vpop.eup %2169 }
 0xd66   :  { %v998_v39 = vmul.f32 %v2170_v35, %v2701_v10  ;;  %v1007_v40 = vmul.f32 %v1828_v38, %v997_v33 }
 0xd68   :  { %v1008_v41 = vmul.f32 %v1828_v38, %v998_v39 }
 0xd6a   :  { %v1014_v42 = vpack.c.bf16 %v1008_v41, %v1007_v40 }
 0xd6c   :  { %1837 = vmatmul.mubr.msk.bf16.vlgmr.msra.gmra.mrb[16].mxu0 %vm248_vm8, %v1014_v42 }
 0xd6d   :  { %1999 = vmatprep.mubr.msk.bf16.mxu0 %vm2320_vm9, %v2316_v19 }
 0xe3f   :  { %v1072_v43 = vpop.f32.mrb[16].mxu0 }
 0xe40   :  { %v2730_v0 = vpop.f32.mrb[17].mxu0  ;;  %v1097_v44 = vmul.f32 %v1072_v43, %v2539_v23  ;;  %v1083_v49 = vmul.f32 %v1072_v43, %v2541_v24  ;;  %v1095_v50 = vmul.f32 %v1072_v43, %v2565_v36  ;;  %v1081_v56 = vmul.f32 %v1072_v43, %v2523_v6 }
 0xe41   :  { %v1076_v45 = vpop.f32.mrb[18].mxu0 }
 0xe42   :  { %1101 = vrot.lane.b32.xlu0 %v1097_v44, %s2317_s28  ;;  %v2734_v32 = vpop.f32.mrb[19].mxu0  ;;  %v1098_v46 = vmul.f32 %v1076_v45, %v2546_v28  ;;  %v1084_v48 = vmul.f32 %v1076_v45, %v2558_v34  ;;  %v1096_v28 = vmul.f32 %v1076_v45, %v2567_v37  ;;  %v1082_v34 = vmul.f32 %v1076_v45, %v2529_v7 }
 0xe43   :  { %v1111_v47 = vpack.c.bf16 %v2734_v32, %v2730_v0 }
 0xe44   :  { %1103 = vrot.lane.b32.xlu1 %v1098_v46, %s2317_s28 }
 0xe45   :  { %2004 = vmatpush3.bf16.msra.mxu1 %v1111_v47 }
 0xe46   :  { %1089 = vrot.lane.b32.xlu0 %v1084_v48, %s2317_s28  ;;  %2015 = vmatprep.subr.bf16.mxu1 %v2316_v19 }
 0xe48   :  { %1087 = vrot.lane.b32.xlu1 %v1083_v49, %s2317_s28 }
 0xeb4   :  { %v1102_v23 = vpop.permute.xlu0 %1101 }
 0xeb5   :  { %v1107_v52 = vadd.f32 %v1102_v23, %v1095_v50 }
 0xeb6   :  { %v1104_v51 = vpop.permute.xlu1 %1103 }
 0xeb7   :  { %v1108_v53 = vadd.f32 %v1104_v51, %v1096_v28 }
 0xeb8   :  { %v1090_v54 = vpop.permute.xlu0 %1089 }
 0xeb9   :  { %v1110_v55 = vpack.c.bf16 %v1108_v53, %v1107_v52  ;;  %v1094_v24 = vadd.f32 %v1090_v54, %v1082_v34 }
 0xeba   :  { %v1088_v60 = vpop.permute.xlu1 %1087 }
 0xebb   :  { %v1093_v62 = vadd.f32 %v1088_v60, %v1081_v56  ;;  %1113 = vrot.lane.b32.xlu1 %v1110_v55, %s2319_s30  ;;  %1242 = vrot.lane.b32.xlu0 %v1110_v55, %s2321_s16 }
 0xebd   :  { %v1109_v63 = vpack.c.bf16 %v1094_v24, %v1093_v62 }
 0xebf   :  { %1240 = vrot.lane.b32.xlu1 %v1109_v63, %s2322_s14 }
 0xf2d   :  { %v1114_v36 = vpop.permute.xlu1 %1113  ;;  %v1243_v1 = vpop.permute.xlu0 %1242 }
 0xf2e   :  { %v1119_v37 = vsel %vm429_vm10, %v1114_v36, 0  ;;  %v1248_v7 = vsel %vm429_vm10, %v1243_v1, 0 }
 0xf2f   :  { %1998 = vmatpush3.bf16.xpose.msra.mxu0 %v1119_v37 }
 0xf30   :  { %2009 = vmatprep.subr.bf16.mxu0 %v2316_v19 }
 0xf31   :  { %v1241_v6 = vpop.permute.xlu1 %1240 }
 0xf36   :  { %2000 = vmatmul.mubr.msk.bf16.vlgmr.msra.gmra.mrb[20].mxu0 %vm429_vm10, %v1109_v63 }
 0xf37   :  { %2010 = vmatpush3.bf16.xpose.msra.mxu0 %v1248_v7  ;;  %2011 = vmatprep.mubr.msk.bf16.mxu0 %vm2320_vm9, %v2316_v19 }
 0xf38   :  { %2021 = vmatprep.subr.bf16.mxu0 %v2316_v19 }
 0xf3e   :  { %2012 = vmatmul.mubr.msk.bf16.vlgmr.msra.gmra.mrb[24].mxu0 %vm429_vm10, %v1241_v6 }
 0xf3f   :  { %2025 = vmatprep.mubr.msk.bf16.mxu0 %vm2320_vm9, %v2316_v19 }
0x1009   :  { %v1155_v2 = vpop.f32.mrb[20].mxu0 }
0x100a   :  { %v1162_v3 = vmul.f32 %v1155_v2, %v2593_v59  ;;  %v2001_v26 = vpop.f32.mrb[21].mxu0 }
0x100b   :  { %v1158_v8 = vpop.f32.mrb[22].mxu0 }
0x100c   :  { %v1163_v11 = vmul.f32 %v1158_v8, %v2598_v61  ;;  %v2002_v13 = vpop.f32.mrb[23].mxu0  ;;  %v1164_v14 = vand.u32 2147483647, %v1162_v3 }
0x100e   :  { %v1166_v15 = vsel %vm429_vm10, %v1164_v14, 0.0  ;;  %v1165_v16 = vand.u32 2147483647, %v1163_v11 }
0x100f   :  { %1167 = vadd.xlane.f32.xlu0 %v1166_v15 }
0x1010   :  { %v1169_v4 = vsel %vm429_vm10, %v1165_v16, 0.0 }
0x1011   :  { %1170 = vadd.xlane.f32.xlu1 %v1169_v4  ;;  %v1284_v30 = vpop.f32.mrb[24].mxu0 }
0x1012   :  { %v1291_v17 = vmul.f32 %v2606_v9, %v1284_v30  ;;  %v2013_v18 = vpop.f32.mrb[25].mxu0 }
0x1013   :  { %v1287_v20 = vpop.f32.mrb[26].mxu0 }
0x1014   :  { %v1292_v59 = vmul.f32 %v2612_v12, %v1287_v20  ;;  %v2014_v21 = vpop.f32.mrb[27].mxu0  ;;  %v1293_v22 = vand.u32 2147483647, %v1291_v17 }
0x1015   :  { %v2113_v21 = vld [vmem:[%s2891_s8 + $0x10] sm:$0xff]  }
0x1016   :  { %v1295_v61 = vsel %vm429_vm10, %v1293_v22, 0.0  ;;  %v1294_v25 = vand.u32 2147483647, %v1292_v59  ;;  %2022 = vmatpush3.bf16.msra.mxu0 %v2113_v21 }
0x1017   :  { %1296 = vadd.xlane.f32.xlu0 %v1295_v61  ;;  %v2114_v61 = vld [vmem:[%s2891_s8 + $0x18] sm:$0xff]   ;;  %2023 = vmatprep.subr.bf16.mxu0 %v2316_v19 }
0x1018   :  { %v1298_v27 = vsel %vm429_vm10, %v1294_v25, 0.0 }
0x101a   :  { %2024 = vmatpush3.bf16.msra.mxu0 %v2114_v61 }
0x101b   :  { %1299 = vadd.xlane.f32.xlu0 %v1298_v27  ;;  %2037 = vmatprep.subr.bf16.mxu0 %v2316_v19 }
0x1022   :  { %1309 = vrot.lane.b32.xlu1 %v1111_v47, %s2322_s14 }
0x109c   :  { %v1168_v29 = vpop.xlane.xlu0 %1167 }
0x109d   :  { %v1172_v31 = vmax.f32 %v1168_v29, 1.0 }
0x109e   :  { %v1171_v33 = vpop.xlane.xlu1 %1170 }
0x109f   :  { %2171 = vrcp.f32 %v1172_v31  ;;  %v1173_v9 = vmax.f32 %v1171_v33, 1.0 }
0x10a1   :  { %2173 = vrcp.f32 %v1173_v9 }
0x10a2   :  { %v1310_v45 = vpop.permute.xlu1 %1309 }
0x10a4   :  { %v1297_v35 = vpop.xlane.xlu0 %1296 }
0x10a5   :  { %v1301_v38 = vmax.f32 %v1297_v35, 1.0  ;;  %v1842_v35 = vmul.f32 -1.442695, %v2730_v0 }
0x10a7   :  { %2175 = vrcp.f32 %v1301_v38  ;;  %v1843_v38 = vmul.f32 -1.442695, %v2734_v32 }
0x10a8   :  { %v1300_v12 = vpop.xlane.xlu0 %1299 }
0x10a9   :  { %v2172_v39 = vpop.eup %2171  ;;  %v1302_v40 = vmax.f32 %v1300_v12, 1.0 }
0x10aa   :  { %v1175_v42 = vmul.f32 %v2172_v39, %v1162_v3 }
0x10ab   :  { %v2174_v41 = vpop.eup %2173  ;;  %2177 = vrcp.f32 %v1302_v40 }
0x10ac   :  { %v1177_v43 = vmul.f32 %v2174_v41, %v1163_v11 }
0x10ae   :  { %v1178_v44 = vpack.c.bf16 %v1177_v43, %v1175_v42 }
0x10b0   :  { %2006 = vmatmul.mubr.msk.bf16.vlgmr.msra.gmra.mrb[20].mxu1 %vm429_vm10, %v1178_v44 }
0x10b1   :  { %2016 = vmatpush3.bf16.msra.mxu1 %v1310_v45  ;;  %2017 = vmatprep.mubr.msk.bf16.mxu1 %vm2320_vm9, %v2316_v19  ;;  %v2176_v46 = vpop.eup %2175 }
0x10b2   :  { %2029 = vmatprep.subr.bf16.mxu1 %v2316_v19  ;;  %v1304_v48 = vmul.f32 %v2176_v46, %v1291_v17 }
0x10b5   :  { %v2178_v47 = vpop.eup %2177 }
0x10b6   :  { %v1306_v49 = vmul.f32 %v2178_v47, %v1292_v59 }
0x10b8   :  { %v1307_v23 = vpack.c.bf16 %v1306_v49, %v1304_v48 }
0x10ba   :  { %2018 = vmatmul.mubr.msk.bf16.vlgmr.msra.gmra.mrb[24].mxu1 %vm429_vm10, %v1307_v23 }
0x10bb   :  { %2033 = vmatprep.mubr.msk.bf16.mxu1 %vm2320_vm9, %v2316_v19 }
0x1183   :  { %v1216_v50 = vpop.f32.mrb[20].mxu1 }
0x1184   :  { %v2007_v28 = vpop.f32.mrb[21].mxu1  ;;  %v1223_v62 = vmul.f32 %v1216_v50, %v1216_v50 }
0x1185   :  { %v1219_v51 = vpop.f32.mrb[22].mxu1 }
0x1186   :  { %v2008_v52 = vpop.f32.mrb[23].mxu1  ;;  %v1224_v36 = vmul.f32 %v1219_v51, %v1219_v51  ;;  %v1225_v37 = vsel %vm429_vm10, %v1223_v62, 0.0 }
0x1188   :  { %v1228_v1 = vsel %vm429_vm10, %v1224_v36, 0.0 }
0x118d   :  { %v1349_v53 = vpop.f32.mrb[24].mxu1 }
0x118e   :  { %v1356_v54 = vmul.f32 %v1349_v53, %v1349_v53  ;;  %v2019_v55 = vpop.f32.mrb[25].mxu1 }
0x118f   :  { %v1352_v34 = vpop.f32.mrb[26].mxu1 }
0x1190   :  { %v1357_v56 = vmul.f32 %v1352_v34, %v1352_v34  ;;  %v2020_v60 = vpop.f32.mrb[27].mxu1  ;;  %v1358_v24 = vsel %vm429_vm10, %v1356_v54, 0.0 }
0x1191   :  { %1359 = vadd.xlane.f32.xlu0 %v1358_v24  ;;  %v2115_v60 = vld [vmem:[%s2893_s10 + $0x10] sm:$0xff]   ;;  %v2116_v24 = vld [vmem:[%s2893_s10 + $0x18] sm:$0xff]  }
0x1192   :  { %v1361_v63 = vsel %vm429_vm10, %v1357_v56, 0.0  ;;  %2030 = vmatpush3.bf16.msra.mxu1 %v2115_v60 }
0x1193   :  { %2031 = vmatprep.subr.bf16.mxu1 %v2316_v19 }
0x1195   :  { %1362 = vadd.xlane.f32.xlu0 %v1361_v63 }
0x1196   :  { %2032 = vmatpush3.bf16.msra.mxu1 %v2116_v24 }
0x1197   :  { %2049 = vmatprep.subr.bf16.mxu1 %v2316_v19 }
0x1199   :  { %1226 = vadd.xlane.f32.xlu0 %v1225_v37 }
0x119d   :  { %1229 = vadd.xlane.f32.xlu0 %v1228_v1 }
0x121e   :  { %v1360_v7 = vpop.xlane.xlu0 %1359 }
0x121f   :  { %v1364_v6 = vmul.f32 0.0625, %v1360_v7 }
0x1221   :  { %v1366_v2 = vadd.f32 1e-05, %v1364_v6 }
0x1222   :  { %v1363_v3 = vpop.xlane.xlu0 %1362 }
0x1223   :  { %2179 = vrsqrt.f32 %v1366_v2  ;;  %v1365_v26 = vmul.f32 0.0625, %v1363_v3 }
0x1225   :  { %v1367_v8 = vadd.f32 1e-05, %v1365_v26  ;;  %v1851_v26 = vld [vmem:[#allocation6 + $0x1] ss:$0 sm:$0xff] }
0x1226   :  { %v1227_v16 = vpop.xlane.xlu0 %1226 }
0x1227   :  { %2181 = vrsqrt.f32 %v1367_v8  ;;  %v1231_v4 = vmul.f32 0.0625, %v1227_v16  ;;  %v2118_v16 = vld [vmem:[%s2894_s11 + $0x28] sm:$0xff]  }
0x1229   :  { %v1233_v17 = vadd.f32 1e-05, %v1231_v4  ;;  %v2119_v4 = vld [vmem:[%s2894_s11 + $0x30] sm:$0xff]  }
0x122a   :  { %v1230_v30 = vpop.xlane.xlu0 %1229 }
0x122b   :  { %v1232_v18 = vmul.f32 0.0625, %v1230_v30  ;;  %2183 = vrsqrt.f32 %v1233_v17  ;;  %v2120_v30 = vld [vmem:[%s2894_s11 + $0x38] sm:$0xff]  }
0x122d   :  { %v2180_v11 = vpop.eup %2179  ;;  %v1234_v20 = vadd.f32 1e-05, %v1232_v18 }
0x122e   :  { %v1370_v13 = vmul.f32 %v2180_v11, %v1349_v53 }
0x122f   :  { %2185 = vrsqrt.f32 %v1234_v20 }
0x1230   :  { %1374 = vrot.lane.b32.xlu1 %v1370_v13, %s2310_s2  ;;  %2187 = vpow2.f32 %v1842_v35 }
0x1231   :  { %v2182_v14 = vpop.eup %2181  ;;  %2189 = vpow2.f32 %v1843_v38 }
0x1232   :  { %v1371_v15 = vmul.f32 %v2182_v14, %v1352_v34 }
0x1234   :  { %1376 = vrot.lane.b32.xlu0 %v1371_v15, %s2310_s2  ;;  %v2117_v15 = vld [vmem:[%s2894_s11 + $0x20] sm:$0xff]  }
0x1235   :  { %v2184_v59 = vpop.eup %2183 }
0x1236   :  { %v1237_v22 = vmul.f32 %v2184_v59, %v1216_v50 }
0x1239   :  { %v2186_v25 = vpop.eup %2185 }
0x123a   :  { %v1238_v31 = vmul.f32 %v2186_v25, %v1219_v51  ;;  %v2188_v12 = vpop.eup %2187 }
0x123b   :  { %v2190_v39 = vpop.eup %2189  ;;  %v1388_v40 = vadd.f32 1.0, %v2188_v12 }
0x123c   :  { %v1389_v41 = vadd.f32 1.0, %v2190_v39 }
0x123d   :  { %2191 = vrcp.f32 %v1388_v40 }
0x123e   :  { %2193 = vrcp.f32 %v1389_v41 }
0x1247   :  { %v2192_v42 = vpop.eup %2191 }
0x1248   :  { %v2194_v43 = vpop.eup %2193  ;;  %v1394_v45 = vmul.f32 %v2192_v42, %v2730_v0 }
0x1249   :  { %v1395_v46 = vmul.f32 %v2194_v43, %v2734_v32 }
0x12a2   :  { %v1375_v27 = vpop.permute.xlu1 %1374 }
0x12a3   :  { %v1380_v29 = vsel %vm429_vm10, %v1237_v22, %v1375_v27 }
0x12a4   :  { %1398 = vrot.lane.b32.xlu1 %v1380_v29, %s2318_s29 }
0x12a6   :  { %v1377_v33 = vpop.permute.xlu0 %1376 }
0x12a7   :  { %v1381_v9 = vsel %vm429_vm10, %v1238_v31, %v1377_v33 }
0x12a8   :  { %1400 = vrot.lane.b32.xlu1 %v1381_v9, %s2318_s29 }
0x1316   :  { %v1399_v44 = vpop.permute.xlu1 %1398 }
0x1317   :  { %v1404_v48 = vmul.f32 %v1399_v44, %v1394_v45 }
0x131a   :  { %v1401_v47 = vpop.permute.xlu1 %1400 }
0x131b   :  { %v1405_v49 = vmul.f32 %v1401_v47, %v1395_v46 }
0x131d   :  { %v1411_v23 = vpack.c.bf16 %v1405_v49, %v1404_v48 }
0x131f   :  { %1413 = vrot.lane.b32.xlu1 %v1411_v23, %s2317_s28 }
0x1391   :  { %v1414_v50 = vpop.permute.xlu1 %1413 }
0x1392   :  { %2026 = vmatmul.mubr.msk.bf16.vlgmr.msra.gmra.mrb[28].mxu0 %vm248_vm8, %v1414_v50 }
0x1393   :  { %2045 = vmatprep.mubr.msk.bf16.mxu0 %vm2320_vm9, %v2316_v19  ;;  %2038 = vmatpush3.bf16.msra.mxu0 %v2117_v15 }
0x1394   :  { %2039 = vmatprep.subr.bf16.mxu0 %v2316_v19 }
0x1397   :  { %2040 = vmatpush3.bf16.msra.mxu0 %v2118_v16 }
0x1398   :  { %2041 = vmatprep.subr.bf16.mxu0 %v2316_v19 }
0x139b   :  { %2042 = vmatpush3.bf16.msra.mxu0 %v2119_v4 }
0x139c   :  { %2043 = vmatprep.subr.bf16.mxu0 %v2316_v19 }
0x139f   :  { %2044 = vmatpush3.bf16.msra.mxu0 %v2120_v30 }
0x1465   :  { %v1464_v28 = vpop.f32.mrb[28].mxu0 }
0x1466   :  { %v2805_v51 = vadd.f32 %v1464_v28, %v2698_v5  ;;  %v2027_v52 = vpop.f32.mrb[29].mxu0  ;;  %v2121_v28 = vld [vmem:[%s2896_s13] sm:$0xff]  }
0x1467   :  { %v1467_v0 = vpop.f32.mrb[30].mxu0 }
0x1468   :  { %v2808_v32 = vadd.f32 %v1467_v0, %v2701_v10  ;;  %v2028_v53 = vpop.f32.mrb[31].mxu0  ;;  %v1473_v54 = vmul.f32 %v2805_v51, %v2805_v51 }
0x146a   :  { %v1475_v55 = vsel %vm248_vm8, %v1473_v54, 0.0  ;;  %v1474_v34 = vmul.f32 %v2808_v32, %v2808_v32 }
0x146b   :  { %1476 = vadd.xlane.f32.xlu1 %v1475_v55 }
0x146c   :  { %v1478_v56 = vsel %vm248_vm8, %v1474_v34, 0.0 }
0x146d   :  { %1479 = vadd.xlane.f32.xlu0 %v1478_v56 }
0x14f8   :  { %v1477_v62 = vpop.xlane.xlu1 %1476 }
0x14f9   :  { %v1481_v63 = vmul.f32 0.03125, %v1477_v62 }
0x14fa   :  { %v1480_v36 = vpop.xlane.xlu0 %1479 }
0x14fb   :  { %v1483_v37 = vadd.f32 1e-05, %v1481_v63  ;;  %v1482_v1 = vmul.f32 0.03125, %v1480_v36 }
0x14fd   :  { %2195 = vrsqrt.f32 %v1483_v37  ;;  %v1484_v7 = vadd.f32 1e-05, %v1482_v1 }
0x14ff   :  { %2197 = vrsqrt.f32 %v1484_v7  ;;  %v1874_v7 = vld [vmem:[#allocation7] ss:$0 sm:$0xff] }
0x1507   :  { %v2196_v6 = vpop.eup %2195 }
0x1508   :  { %v1487_v2 = vmul.f32 %v2196_v6, %v2805_v51 }
0x1509   :  { %v2198_v3 = vpop.eup %2197 }
0x150a   :  { %v1488_v8 = vmul.f32 %v2198_v3, %v2808_v32  ;;  %v1497_v11 = vmul.f32 %v1851_v26, %v1487_v2 }
0x150c   :  { %v1498_v13 = vmul.f32 %v1851_v26, %v1488_v8 }
0x150e   :  { %v1504_v14 = vpack.c.bf16 %v1498_v13, %v1497_v11 }
0x1510   :  { %2034 = vmatmul.mubr.msk.bf16.vlgmr.msra.gmra.mrb[28].mxu1 %vm248_vm8, %v1504_v14 }
0x1511   :  { %2053 = vmatprep.mubr.msk.bf16.mxu1 %vm2320_vm9, %v2316_v19  ;;  %2050 = vmatpush3.bf16.msra.mxu1 %v2121_v28 }
0x1512   :  { %2051 = vmatprep.subr.bf16.mxu1 %v2316_v19 }
0x15e3   :  { %v1554_v17 = vpop.f32.mrb[28].mxu1 }
0x15e4   :  { %1577 = vrot.lane.b32.xlu1 %v1554_v17, %s2319_s30  ;;  %v2035_v18 = vpop.f32.mrb[29].mxu1  ;;  %v1859_v21 = vmul.f32 -1.442695, %v1554_v17 }
0x15e5   :  { %v1557_v20 = vpop.f32.mrb[30].mxu1 }
0x15e6   :  { %1579 = vrot.lane.b32.xlu0 %v1557_v20, %s2319_s30  ;;  %v2036_v59 = vpop.f32.mrb[31].mxu1  ;;  %v1860_v22 = vmul.f32 -1.442695, %v1557_v20  ;;  %2199 = vpow2.f32 %v1859_v21 }
0x15e8   :  { %2201 = vpow2.f32 %v1860_v22 }
0x15f0   :  { %v2200_v61 = vpop.eup %2199 }
0x15f1   :  { %v1567_v27 = vadd.f32 1.0, %v2200_v61 }
0x15f2   :  { %v2202_v25 = vpop.eup %2201 }
0x15f3   :  { %v1568_v29 = vadd.f32 1.0, %v2202_v25  ;;  %2203 = vrcp.f32 %v1567_v27 }
0x15f5   :  { %2205 = vrcp.f32 %v1568_v29 }
0x15fd   :  { %v2204_v31 = vpop.eup %2203 }
0x15fe   :  { %v1573_v35 = vmul.f32 %v2204_v31, %v1554_v17 }
0x15ff   :  { %v2206_v33 = vpop.eup %2205 }
0x1600   :  { %v1574_v38 = vmul.f32 %v2206_v33, %v1557_v20 }
0x1656   :  { %v1578_v9 = vpop.permute.xlu1 %1577 }
0x1657   :  { %v1583_v39 = vmul.f32 %v1578_v9, %v1573_v35 }
0x1658   :  { %v1580_v12 = vpop.permute.xlu0 %1579 }
0x1659   :  { %v1584_v40 = vmul.f32 %v1580_v12, %v1574_v38 }
0x165b   :  { %v1594_v41 = vpack.c.bf16 %v1584_v40, %v1583_v39 }
0x165d   :  { %2046 = vmatmul.mubr.msk.bf16.vlgmr.msra.gmra.mrb[32].mxu0 %vm936_vm11, %v1594_v41 }
0x1730   :  { %v1656_v42 = vpop.f32.mrb[32].mxu0 }
0x1731   :  { %v1663_v43 = vadd.f32 %v1656_v42, %v2805_v51  ;;  %v2047_v44 = vpop.f32.mrb[33].mxu0  ;;  %v2122_v51 = vld [vmem:[%s2896_s13 + $0x8] sm:$0xff]  }
0x1732   :  { %v1659_v45 = vpop.f32.mrb[34].mxu0  ;;  %2052 = vmatpush3.bf16.msra.mxu1 %v2122_v51 }
0x1733   :  { %v1664_v46 = vadd.f32 %v1659_v45, %v2808_v32  ;;  %v2048_v47 = vpop.f32.mrb[35].mxu0  ;;  %v1665_v48 = vmul.f32 %v1663_v43, %v1663_v43 }
0x1735   :  { %v1667_v49 = vsel %vm248_vm8, %v1665_v48, 0.0  ;;  %v1666_v23 = vmul.f32 %v1664_v46, %v1664_v46 }
0x1736   :  { %1668 = vadd.xlane.f32.xlu1 %v1667_v49 }
0x1737   :  { %v1670_v50 = vsel %vm248_vm8, %v1666_v23, 0.0 }
0x1738   :  { %1671 = vadd.xlane.f32.xlu0 %v1670_v50 }
0x1747   :  { %1755 = vrot.lane.b32.xlu1 %v2698_v5, %s2318_s29 }
0x174b   :  { %1763 = vrot.lane.b32.xlu1 %v1663_v43, %s2319_s30 }
0x174e   :  { %1757 = vrot.lane.b32.xlu0 %v2701_v10, %s2318_s29 }
0x174f   :  { %1765 = vrot.lane.b32.xlu1 %v1664_v46, %s2319_s30 }
0x17c3   :  { %v1669_v5 = vpop.xlane.xlu1 %1668 }
0x17c4   :  { %v1673_v52 = vmul.f32 0.03125, %v1669_v5 }
0x17c5   :  { %v1672_v0 = vpop.xlane.xlu0 %1671 }
0x17c6   :  { %v1675_v32 = vadd.f32 1e-05, %v1673_v52  ;;  %v1674_v53 = vmul.f32 0.03125, %v1672_v0 }
0x17c7   :  { %v1756_v10 = vpop.permute.xlu1 %1755 }
0x17c8   :  { %2207 = vrsqrt.f32 %v1675_v32  ;;  %v1676_v54 = vadd.f32 1e-05, %v1674_v53  ;;  %v1769_v55 = vsel %vm248_vm8, %v2494_v58, %v1756_v10 }
0x17c9   :  { %v1758_v56 = vpop.permute.xlu0 %1757 }
0x17ca   :  { %2209 = vrsqrt.f32 %v1676_v54  ;;  %v1770_v19 = vsel %vm248_vm8, %v2492_v57, %v1758_v56 }
0x17cb   :  { %v1764_v34 = vpop.permute.xlu1 %1763 }
0x17cc   :  { %v1771_v60 = vsel %vm936_vm11, %v1769_v55, %v1764_v34 }
0x17cd   :  { %v1774_v24 = vsel %vm1773_vm12, %v1771_v60, 0.0 }
0x17ce   :  { %1776 = vst [vmem:[%s2898_s15] sm:$0xff] %v1774_v24 }
0x17cf   :  { %v1766_v62 = vpop.permute.xlu1 %1765 }
0x17d0   :  { %v1772_v63 = vsel %vm936_vm11, %v1770_v19, %v1766_v62 }
0x17d1   :  { %v1775_v36 = vsel %vm1773_vm12, %v1772_v63, 0.0 }
0x17d2   :  { %v2208_v37 = vpop.eup %2207  ;;  %1777 = vst [vmem:[%s2898_s15 + $0x8] sm:$0xff] %v1775_v36 }
0x17d3   :  { %v1679_v58 = vmul.f32 %v2208_v37, %v1663_v43 }
0x17d4   :  { %v2210_v1 = vpop.eup %2209 }
0x17d5   :  { %v1680_v6 = vmul.f32 %v2210_v1, %v1664_v46  ;;  %v1688_v2 = vmul.f32 %v1874_v7, %v1679_v58 }
0x17d7   :  { %v1689_v3 = vmul.f32 %v1874_v7, %v1680_v6 }
0x17d9   :  { %v1694_v26 = vpack.c.bf16 %v1689_v3, %v1688_v2 }
0x17db   :  { %2054 = vmatmul.mubr.msk.bf16.vlgmr.msra.gmra.mrb[32].mxu1 %vm248_vm8, %v1694_v26 }
0x18ae   :  { %v1744_v8 = vpop.f32.mrb[32].mxu1 }
0x18af   :  { %1751 = vst [vmem:[%s2901_s26] sm:$0xff] %v1744_v8  ;;  %v2055_v57 = vpop.f32.mrb[33].mxu1 }
0x18b0   :  { %v1747_v11 = vpop.f32.mrb[34].mxu1 }
0x18b1   :  { %1752 = vst [vmem:[%s2901_s26 + $0x8] sm:$0xff] %v1747_v11  ;;  %v2056_v13 = vpop.f32.mrb[35].mxu1 }
0x18b2   :  { %1786 = vsyncpa [#allocation3], 1 }
0x18b3   :  { %1787 = vsyncpa [#allocation5], 1 }
0x18b4   :  { %1788 = vsyncpa [#allocation8], 1 }

</bundles_post_ra>
